<compile_context>
chip_gen: v6e
topology: v6e:2x2x1
jax: 0.10.0
libtpu: 0.0.40
codegen_flags: <defaults>
</compile_context>

<pallas_src>
import functools

import jax
import jax.numpy as jnp
from jax.experimental import pallas as pl
from jax.experimental.pallas import tpu as pltpu

C_FEAT = 1408   # backbone feature channels (e.g. efficientnet_b2)
N_CLS = 3
K = 3           # stem conv kernel size


def _fused_kernel(patches_ref, wconv_ref, bconv_ref, wlin_ref, blin_ref,
                  out_ref, acc_ref, *, inv_hw):
    """One (batch b, spatial tile t) grid step.

    patches_ref: (TM, 9)      bf16 im2col patches of tile t of batch b
    wconv_ref:   (9, 1408)    bf16 stem conv weight (flattened 3x3)
    bconv_ref:   (1, 1408)    f32 stem conv bias
    wlin_ref:    (1408, 3)    f32 linear weight (pre-transposed)
    blin_ref:    (1, 3)       f32 linear bias
    out_ref:     (1, 1, 3)    f32 logits for batch b
    acc_ref:     (1, 1408)    f32 pooled-sum accumulator (VMEM scratch)
    """
    t = pl.program_id(1)

    @pl.when(t == 0)
    def _init():
        acc_ref[...] = jnp.zeros_like(acc_ref)

    # Stem conv as an MXU matmul: bf16 inputs, f32 accumulation.
    feats = jnp.dot(patches_ref[...], wconv_ref[...],
                    preferred_element_type=jnp.float32) + bconv_ref[...]
    # SiLU activation in f32 (VPU mul + EUP exp).
    feats = feats * jax.nn.sigmoid(feats)
    # AdaptiveAvgPool2d(1): per-tile partial sum over spatial positions.
    acc_ref[...] += jnp.sum(feats, axis=0, keepdims=True)

    @pl.when(t == pl.num_programs(1) - 1)
    def _finalize():
        pooled = acc_ref[...] * inv_hw                    # (1, 1408) mean
        # Dropout(p=0.5) is identity in eval mode.
        head = jnp.dot(pooled, wlin_ref[...],
                       preferred_element_type=jnp.float32) + blin_ref[...]
        out_ref[...] = head.reshape(1, 1, N_CLS)


def _im2col_3x3(x):
    """x: (B, 1, H, W) -> (B, H*W, 9) patches (padding=1, stride=1)."""
    B, _, H, W = x.shape
    xp = jnp.pad(x, ((0, 0), (0, 0), (1, 1), (1, 1)))
    cols = [xp[:, 0, di:di + H, dj:dj + W]
            for di in range(K) for dj in range(K)]
    patches = jnp.stack(cols, axis=-1)                    # (B, H, W, 9)
    return patches.reshape(B, H * W, K * K)


def _choose_tile(hw, cap=1024):
    """Largest multiple of 16 that divides hw and is <= cap (bf16 sublane tile)."""
    cand = min(hw, cap)
    cand -= cand % 16
    while cand >= 16:
        if hw % cand == 0:
            return cand
        cand -= 16
    return hw   # fall back to a single full-extent tile


def model_forward(x, params, *, tm=None):
    """x: (B, 1, H, W) float32, NCHW like PyTorch. Returns (B, 3) float32."""
    B, Cin, H, W = x.shape
    assert Cin == 1
    HW = H * W
    if tm is None:
        tm = _choose_tile(HW)
    assert HW % tm == 0, (HW, tm)
    T = HW // tm

    patches = _im2col_3x3(x).astype(jnp.bfloat16)                 # (B, HW, 9)
    wconv = params["wconv"].reshape(C_FEAT, K * K).T.astype(jnp.bfloat16)
    bconv = params["bconv"].reshape(1, C_FEAT).astype(jnp.float32)
    wlin = params["wlin"].T.astype(jnp.float32)                   # (1408, 3)
    blin = params["blin"].reshape(1, N_CLS).astype(jnp.float32)   # (1, 3)

    kernel = functools.partial(_fused_kernel, inv_hw=1.0 / float(HW))

    cost = pl.CostEstimate(
        flops=2 * B * HW * (K * K) * C_FEAT + 2 * B * C_FEAT * N_CLS,
        transcendentals=B * HW * C_FEAT,
        bytes_accessed=(patches.size * 2 + wconv.size * 2
                        + (bconv.size + wlin.size + blin.size) * 4
                        + B * N_CLS * 4),
    )

    out = pl.pallas_call(
        kernel,
        out_shape=jax.ShapeDtypeStruct((B, 1, N_CLS), jnp.float32),
        grid_spec=pltpu.PrefetchScalarGridSpec(
            num_scalar_prefetch=0,
            grid=(B, T),
            in_specs=[
                pl.BlockSpec((None, tm, K * K), lambda b, t: (b, t, 0)),
                pl.BlockSpec((K * K, C_FEAT), lambda b, t: (0, 0)),
                pl.BlockSpec((1, C_FEAT), lambda b, t: (0, 0)),
                pl.BlockSpec((C_FEAT, N_CLS), lambda b, t: (0, 0)),
                pl.BlockSpec((1, N_CLS), lambda b, t: (0, 0)),
            ],
            out_specs=pl.BlockSpec((1, 1, N_CLS), lambda b, t: (b, 0, 0)),
            scratch_shapes=[pltpu.VMEM((1, C_FEAT), jnp.float32)],
        ),
        compiler_params=pltpu.CompilerParams(
            dimension_semantics=("parallel", "arbitrary"),
            vmem_limit_bytes=32 * 1024 * 1024,   # above v5e default, safe on v7x
        ),
        cost_estimate=cost,
    )(patches, wconv, bconv, wlin, blin)
    return out.reshape(B, N_CLS)


def init_params(key):
    k1, k2, k3, k4 = jax.random.split(key, 4)
    return {
        # stem conv: (out=1408, in=1, 3, 3) like nn.Conv2d(1, 1408, 3, padding=1)
        "wconv": jax.random.normal(k1, (C_FEAT, 1, K, K), jnp.float32) * 0.1,
        "bconv": jax.random.normal(k2, (C_FEAT,), jnp.float32) * 0.01,
        # linear: nn.Linear(1408, 3) -> weight (3, 1408), bias (3,)
        "wlin": jax.random.normal(k3, (N_CLS, C_FEAT), jnp.float32) * 0.02,
        "blin": jax.random.normal(k4, (N_CLS,), jnp.float32) * 0.01,
    }


def _reference_forward(x, params):
    """Pure-JAX reference of the same computation (same bf16 conv inputs)."""
    patches = _im2col_3x3(x).astype(jnp.bfloat16)                 # (B, HW, 9)
    wconv = params["wconv"].reshape(C_FEAT, K * K).T.astype(jnp.bfloat16)
    feats = jnp.einsum("bmk,kc->bmc", patches, wconv,
                       preferred_element_type=jnp.float32)
    feats = feats + params["bconv"][None, None, :]
    feats = feats * jax.nn.sigmoid(feats)
    pooled = feats.mean(axis=1)                                   # (B, 1408)
    return pooled @ params["wlin"].T + params["blin"][None, :]    # (B, 3)


if __name__ == "__main__":
    key = jax.random.PRNGKey(0)
    kx, kp = jax.random.split(key)
    B, H, W = 2, 16, 16
    x = jax.random.normal(kx, (B, 1, H, W), jnp.float32)          # NCHW, in_chans=1
    params = init_params(kp)

    # tm=64 -> grid=(2, 4): exercises multi-tile accumulation + finalize path.
    out = jax.block_until_ready(model_forward(x, params, tm=64))
    ref = _reference_forward(x, params)
    assert out.shape == (B, N_CLS)
    assert jnp.allclose(out, ref, atol=1e-3, rtol=1e-3), (out, ref)
    print("KERNEL_OK")
</pallas_src>

<mosaic_0001>
module attributes {stable_mosaic.version = 11 : i64} {
  func.func @_fused_kernel(%arg0: i32, %arg1: i32, %arg2: memref<1x64x9xbf16, #tpu.memory_space<vmem>>, %arg3: memref<9x1408xbf16, #tpu.memory_space<vmem>>, %arg4: memref<1x1408xf32, #tpu.memory_space<vmem>>, %arg5: memref<1408x3xf32, #tpu.memory_space<vmem>>, %arg6: memref<1x3xf32, #tpu.memory_space<vmem>>, %arg7: memref<1x1x3xf32, #tpu.memory_space<vmem>>, %arg8: memref<1x1408xf32, #tpu.memory_space<vmem>>) attributes {dimension_semantics = [#tpu.dimension_semantics<parallel>, #tpu.dimension_semantics<arbitrary>], iteration_bounds = array<i64: 2, 4>, scalar_prefetch = 0 : i64, scratch_operands = 1 : i64, tpu.core_type = #tpu.core_type<tc>, window_params = [{transform_indices = @transform_0, window_bounds = array<i64: 1, 64, 9>}, {pipeline_mode = #tpu.pipeline_mode<synchronous>, transform_indices = @transform_1, window_bounds = array<i64: 9, 1408>}, {pipeline_mode = #tpu.pipeline_mode<synchronous>, transform_indices = @transform_2, window_bounds = array<i64: 1, 1408>}, {pipeline_mode = #tpu.pipeline_mode<synchronous>, transform_indices = @transform_3, window_bounds = array<i64: 1408, 3>}, {pipeline_mode = #tpu.pipeline_mode<synchronous>, transform_indices = @transform_4, window_bounds = array<i64: 1, 3>}, {transform_indices = @transform_5, window_bounds = array<i64: 1, 1, 3>}]} {
    %c0_i32 = arith.constant 0 : i32
    %0 = arith.cmpi eq, %arg1, %c0_i32 : i32
    %1 = arith.extui %0 : i1 to i32
    %c0_i32_0 = arith.constant 0 : i32
    %2 = arith.cmpi ne, %1, %c0_i32_0 : i32
    scf.if %2 {
      %cst_14 = arith.constant 0.000000e+00 : f32
      %24 = vector.broadcast %cst_14 : f32 to vector<1x1408xf32>
      %c0_15 = arith.constant 0 : index
      %c0_16 = arith.constant 0 : index
      %25 = vector.load %arg8[%c0_15, %c0_16] : memref<1x1408xf32, #tpu.memory_space<vmem>>, vector<1x1408xf32>
      tpu.vector_store %arg8[%c0_15, %c0_16], %24 {strides = array<i32>} : memref<1x1408xf32, #tpu.memory_space<vmem>>, vector<1x1408xf32>,
    } else {
    }
    %c0 = arith.constant 0 : index
    %c0_1 = arith.constant 0 : index
    %c0_2 = arith.constant 0 : index
    %3 = vector.load %arg2[%c0, %c0_1, %c0_2] : memref<1x64x9xbf16, #tpu.memory_space<vmem>>, vector<1x64x9xbf16>
    %4 = vector.shape_cast %3 : vector<1x64x9xbf16> to vector<64x9xbf16>
    %c0_3 = arith.constant 0 : index
    %c0_4 = arith.constant 0 : index
    %5 = vector.load %arg3[%c0_3, %c0_4] : memref<9x1408xbf16, #tpu.memory_space<vmem>>, vector<9x1408xbf16>
    %cst = arith.constant dense<0.000000e+00> : vector<64x1408xf32>
    %6 = tpu.matmul %4, %5, %cst {dimension_numbers = #tpu.dot_dimension_numbers<[1], [0], [0], [1], [0, 0, 1, 1], [], []>} : vector<64x9xbf16>, vector<9x1408xbf16>, vector<64x1408xf32> -> vector<64x1408xf32>
    %c0_5 = arith.constant 0 : index
    %c0_6 = arith.constant 0 : index
    %7 = vector.load %arg4[%c0_5, %c0_6] : memref<1x1408xf32, #tpu.memory_space<vmem>>, vector<1x1408xf32>
    %8 = vector.broadcast %7 : vector<1x1408xf32> to vector<64x1408xf32>
    %9 = arith.addf %6, %8 : vector<64x1408xf32>
    %10 = arith.negf %9 : vector<64x1408xf32>
    %11 = math.exp %10 : vector<64x1408xf32>
    %cst_7 = arith.constant 1.000000e+00 : f32
    %12 = vector.broadcast %cst_7 : f32 to vector<64x1408xf32>
    %13 = arith.addf %12, %11 : vector<64x1408xf32>
    %14 = arith.divf %12, %13 : vector<64x1408xf32>
    %15 = arith.mulf %9, %14 : vector<64x1408xf32>
    %c0_8 = arith.constant 0 : index
    %c0_9 = arith.constant 0 : index
    %16 = vector.load %arg8[%c0_8, %c0_9] : memref<1x1408xf32, #tpu.memory_space<vmem>>, vector<1x1408xf32>
    %cst_10 = arith.constant dense<0.000000e+00> : vector<1408xf32>
    %17 = vector.multi_reduction <add>, %15, %cst_10 [0] : vector<64x1408xf32> to vector<1408xf32>
    %18 = vector.shape_cast %17 : vector<1408xf32> to vector<1x1408xf32>
    %19 = arith.addf %16, %18 : vector<1x1408xf32>
    %c0_11 = arith.constant 0 : index
    %c0_12 = arith.constant 0 : index
    %20 = vector.load %arg8[%c0_11, %c0_12] : memref<1x1408xf32, #tpu.memory_space<vmem>>, vector<1x1408xf32>
    tpu.vector_store %arg8[%c0_11, %c0_12], %19 {strides = array<i32>} : memref<1x1408xf32, #tpu.memory_space<vmem>>, vector<1x1408xf32>,
    %c3_i32 = arith.constant 3 : i32
    %21 = arith.cmpi eq, %arg1, %c3_i32 : i32
    %22 = arith.extui %21 : i1 to i32
    %c0_i32_13 = arith.constant 0 : i32
    %23 = arith.cmpi ne, %22, %c0_i32_13 : i32
    scf.if %23 {
      %c0_14 = arith.constant 0 : index
      %c0_15 = arith.constant 0 : index
      %24 = vector.load %arg8[%c0_14, %c0_15] : memref<1x1408xf32, #tpu.memory_space<vmem>>, vector<1x1408xf32>
      %cst_16 = arith.constant 3.906250e-03 : f32
      %25 = vector.broadcast %cst_16 : f32 to vector<1x1408xf32>
      %26 = arith.mulf %24, %25 : vector<1x1408xf32>
      %c0_17 = arith.constant 0 : index
      %c0_18 = arith.constant 0 : index
      %27 = vector.load %arg5[%c0_17, %c0_18] : memref<1408x3xf32, #tpu.memory_space<vmem>>, vector<1408x3xf32>
      %cst_19 = arith.constant dense<0.000000e+00> : vector<1x3xf32>
      %28 = tpu.matmul %26, %27, %cst_19 {dimension_numbers = #tpu.dot_dimension_numbers<[1], [0], [0], [1], [0, 0, 1, 1], [], []>} : vector<1x1408xf32>, vector<1408x3xf32>, vector<1x3xf32> -> vector<1x3xf32>
      %c0_20 = arith.constant 0 : index
      %c0_21 = arith.constant 0 : index
      %29 = vector.load %arg6[%c0_20, %c0_21] : memref<1x3xf32, #tpu.memory_space<vmem>>, vector<1x3xf32>
      %30 = arith.addf %28, %29 : vector<1x3xf32>
      %31 = vector.shape_cast %30 : vector<1x3xf32> to vector<1x1x3xf32>
      %c0_22 = arith.constant 0 : index
      %c0_23 = arith.constant 0 : index
      %c0_24 = arith.constant 0 : index
      %32 = vector.load %arg7[%c0_22, %c0_23, %c0_24] : memref<1x1x3xf32, #tpu.memory_space<vmem>>, vector<1x1x3xf32>
      tpu.vector_store %arg7[%c0_22, %c0_23, %c0_24], %31 {strides = array<i32>} : memref<1x1x3xf32, #tpu.memory_space<vmem>>, vector<1x1x3xf32>,
    } else {
    }
    return
  }
  func.func @transform_0(%arg0: i32, %arg1: i32) -> (i32, i32, i32) {
    %c0_i32 = arith.constant 0 : i32
    %c0_i32_0 = arith.constant 0 : i32
    return %arg0, %arg1, %c0_i32 : i32, i32, i32
  }
  func.func @transform_1(%arg0: i32, %arg1: i32) -> (i32, i32) {
    %c0_i32 = arith.constant 0 : i32
    %c0_i32_0 = arith.constant 0 : i32
    %c0_i32_1 = arith.constant 0 : i32
    return %c0_i32, %c0_i32_0 : i32, i32
  }
  func.func @transform_2(%arg0: i32, %arg1: i32) -> (i32, i32) {
    %c0_i32 = arith.constant 0 : i32
    %c0_i32_0 = arith.constant 0 : i32
    %c0_i32_1 = arith.constant 0 : i32
    return %c0_i32, %c0_i32_0 : i32, i32
  }
  func.func @transform_3(%arg0: i32, %arg1: i32) -> (i32, i32) {
    %c0_i32 = arith.constant 0 : i32
    %c0_i32_0 = arith.constant 0 : i32
    %c0_i32_1 = arith.constant 0 : i32
    return %c0_i32, %c0_i32_0 : i32, i32
  }
  func.func @transform_4(%arg0: i32, %arg1: i32) -> (i32, i32) {
    %c0_i32 = arith.constant 0 : i32
    %c0_i32_0 = arith.constant 0 : i32
    %c0_i32_1 = arith.constant 0 : i32
    return %c0_i32, %c0_i32_0 : i32, i32
  }
  func.func @transform_5(%arg0: i32, %arg1: i32) -> (i32, i32, i32) {
    %c0_i32 = arith.constant 0 : i32
    %c0_i32_0 = arith.constant 0 : i32
    %c0_i32_1 = arith.constant 0 : i32
    return %arg0, %c0_i32, %c0_i32_0 : i32, i32, i32
  }
}

</mosaic_0001>

<bundles_post_ra>
// kernel: tpu_custom_call.1
= control target key start
LH: loop header
LB: loop body
LE: loop exit
PB: predicated region body
PF: predicated region fallthrough
CT: control target
= control target key end

     0   :  { %10 = vsyncpa [#allocation4], 0  ;;  %s5225_s0 = inlined_call_operand.vmem [shape: bf16[2,256,9], index: 0, kind: input, shape index: {}]   ;;  %s5226_s1 = inlined_call_operand.vmem [shape: bf16[9,1408], index: 1, kind: input, shape index: {}]   ;;  %s5227_s2 = inlined_call_operand.vmem [shape: f32[1,1408], index: 2, kind: input, shape index: {}]   ;;  %s5228_s3 = inlined_call_operand.vmem [shape: f32[1408,3], index: 3, kind: input, shape index: {}]   ;;  %s5229_s4 = inlined_call_operand.vmem [shape: f32[1,3], index: 4, kind: input, shape index: {}]   ;;  %s5230_s5 = inlined_call_operand.hbm [shape: f32[2,1,3], index: 5, kind: output, shape index: {}]  }
   0x1   :  { %12 = vsyncpa [#allocation4 + $0x1], 0  ;;  %s3452_s18 = smov 0   ;;  %s3454_s19 = smov 0  }
   0x2   :  { %s3456_s20 = smov 0   ;;  %s3458_s21 = smov 0  }
   0x3   :  { %s3460_s22 = smov 0   ;;  %s3462_s23 = smov 0  }
   0x4   :  { %s3464_s24 = smov 0   ;;  %s3466_s25 = smov 0  }
   0x5 LB: > { %s2488_s26 = sadd.s32 4294967295, %s3413_s25   ;;  %s2489_s27 = sadd.s32 4294967294, %s3413_s25   ;;  %s3413_s25 = sphi %s3466_s25, %s18_s25   ;;  %s3409_s24 = sphi %s3464_s24, %s5455_s24   ;;  %s3405_s23 = sphi %s3462_s23, %s5454_s23   ;;  %s3401_s22 = sphi %s3460_s22, %s5453_s22   ;;  %s3397_s21 = sphi %s3458_s21, %s5452_s21   ;;  %s3393_s20 = sphi %s3456_s20, %s5451_s20   ;;  %s3389_s19 = sphi %s3454_s19, %s5450_s19   ;;  %s3385_s18 = sphi %s3452_s18, %s5449_s18  }
   0x6   : > { %s27_s28 = sadd.s32 1, %s3405_s23  ;;  %s30_s29 = sadd.s32 1, %s3409_s24 }
   0x7   : > { %p28_p0 = scmp.ge.s32.totalorder %s27_s28, 4  ;;  %p159_p1 = scmp.ne.s32.totalorder %s3393_s20, %s3389_s19 }
   0x8   : > { %p160_p2 = scmp.eq.s32.totalorder %s2488_s26, 7  ;;  %p165_p4 = scmp.ne.s32.totalorder %s3389_s19, %s3385_s18 }
   0x9   : > { %s5457_s28 = smov (%p28_p0, %s27_s28), 0  ;;  %s5459_s29 = smov (!%p28_p0, %s30_s29), %s3409_s24 }
   0xa   : > { %p3501_p3 = por %p160_p2, %p159_p1  ;;  %p32_p5 = scmp.ge.s32.totalorder %s5459_s29, 2 }
   0xb   : > { %p166_p6 = scmp.eq.s32.totalorder %s2489_s27, 7  ;;  %p2492_p7 = scmp.ge.s32.totalorder %s3413_s25, 1 }
   0xc   : > { %p209_p8 = scmp.lt.s32.totalorder %s3413_s25, 9  ;;  %s5461_s29 = smov (%p32_p5, %s5459_s29), 0 }
   0xd   : > { %p3511_p9 = por %p166_p6, %p165_p4  ;;  %s146_s7 = ssub.s32 %s3409_s24, %s5461_s29 }
   0xe   : > { %p210_p10 = pnand %p2492_p7, %p209_p8  ;;  %s149_s8 = sadd.s32 1, %s3393_s20 }
   0xf   : > { %p147_p11 = scmp.eq.s32.totalorder %s146_s7, 0 }
  0x10   : > { %213 = sbr.rel (%p210_p10) target bundleno = 788 (0x314), region = 40 }
  0x11   : > { %s3519_s9 = scalar_select %p147_p11, %s3393_s20, %s149_s8  }
  0x15   : > { %s238_s10 = sand.u32 1, %s3389_s19   ;;  %s2493_s11 = sshll.u32 %s3397_s21, 3 }
  0x16   : > { %p241_p12 = scmp.lt.s32.totalorder %s3401_s22, 1  ;;  %p243_p13 = scmp.lt.s32.totalorder %s2493_s11, 31 }
  0x17   : > { %s3532_s27 = scalar_lea.vmem [#allocation3], %s238_s10  ;;  %p2496_p0 = scmp.ne.s32.totalorder %s3397_s21, 0 }
  0x18   : > { %s242_s12 = scalar_select %p241_p12, %s3401_s22, 1 }
  0x19   : > { %s5463_s11 = smov (!%p243_p13, %s2493_s11), 31  ;;  %254 = sbr.rel (%p2496_p0) target bundleno = 34 (0x22), region = 44 }
  0x1a   : > { %s2494_s13 = sshll.u32 %s242_s12, 5 }
  0x1b   : > { %s246_s14 = sadd.s32 %s2494_s13, %s5463_s11 }
  0x1c   : > { %s2495_s15 = sshll.u32 %s246_s14, 2 }
  0x1d   : > { %s3528_s26 = scalar_lea.vmem %s5225_s0, %s2495_s15 }
  0x1e   : > { %v256_v0 = vlaneseq  ;;  %v3415_v1 = vmov 0.0  }
  0x1f   : > { %255 = vst [vmem:[#allocation2] sm:$0xff] %v3415_v1 }
  0x20   : > { %vm258_vm0 = vcmp.lt.s32.totalorder %v256_v0, 384 }
  0x21   : > { %260 = vst.msk [vmem:[#allocation2 + $0x8] sm:$0x7] %vm258_vm0, %v3415_v1 }
  0x22 PF: > { %v2949_v2 = vld [vmem:[%s5226_s1 + $0x4] ss:$44 sps:$4 sm:$0x1f]   ;;  %vm418_vm1 = vcmask 1043456   ;;  %vm419_vm2 = vcmask 1044480   ;;  %v3416_v4 = vmov 65535   ;;  %v5233_v32 = vlaneseq }
  0x23   : > { %v2951_v3 = vld [vmem:[%s5226_s1] ss:$44 sps:$4 sm:$0x1f]   ;;  %v420_v5 = vsel %vm418_vm1, 4294967295, %v3416_v4  ;;  %v3417_v7 = vmov 0   ;;  %v3547_v11 = vld [vmem:[%s3528_s26 + $0x18] sm:$0xff]  }
  0x24   : > { %v421_v6 = vsel %vm419_vm2, %v420_v5, 0  ;;  %487 = vmatprep.mubr.bf16.mxu0 %v3417_v7  ;;  %517 = vmatprep.mubr.bf16.mxu1 %v3417_v7  ;;  %v3544_v10 = vld [vmem:[%s3528_s26] sm:$0xff]   ;;  %v2954_v12 = vld [vmem:[%s5226_s1 + $0x8] ss:$44 sps:$4 sm:$0x1f]   ;;  %vm405_vm3 = vcmask 72704  }
  0x25   : > { %v426_v8 = vand.u32 %v2949_v2, %v421_v6  ;;  %v423_v9 = vand.u32 %v2951_v3, %v421_v6  ;;  %v2956_v13 = vld [vmem:[%s5226_s1 + $0xc] ss:$44 sps:$4 sm:$0x1f]   ;;  %v2957_v14 = vld [vmem:[%s5226_s1 + $0x10] ss:$44 sps:$4 sm:$0x1f]   ;;  %v429_v16 = vand.u32 %v2954_v12, %v421_v6 }
  0x26   : > { %v432_v15 = vand.u32 %v2956_v13, %v421_v6  ;;  %v2959_v17 = vld [vmem:[%s5226_s1 + $0x14] ss:$44 sps:$4 sm:$0x1f]   ;;  %v435_v18 = vand.u32 %v2957_v14, %v421_v6  ;;  %v2963_v20 = vld [vmem:[%s5226_s1 + $0x1c] ss:$44 sps:$4 sm:$0x1f]  }
  0x27   : > { %469 = vmatprep.subr.bf16.mxu0 %v426_v8  ;;  %2870 = vmatprep.subr.bf16.mxu1 %v426_v8  ;;  %v438_v19 = vand.u32 %v2959_v17, %v421_v6  ;;  %v2961_v21 = vld [vmem:[%s5226_s1 + $0x18] ss:$44 sps:$4 sm:$0x1f]   ;;  %v444_v22 = vand.u32 %v2963_v20, %v421_v6  ;;  %v2968_v24 = vld [vmem:[%s5226_s1 + $0x28] ss:$44 sps:$4 sm:$0x1f]  }
  0x28   : > { %470 = vmatpush1.bf16.msra.mxu0 %v423_v9  ;;  %2871 = vmatpush1.bf16.msra.mxu1 %v423_v9  ;;  %v2967_v23 = vld [vmem:[%s5226_s1 + $0x24] ss:$44 sps:$4 sm:$0x1f]   ;;  %v2960_v25 = vld [vmem:[%s3528_s26 + $0x8] sm:$0xff]   ;;  %v441_v27 = vand.u32 %v2961_v21, %v421_v6  ;;  %v453_v28 = vand.u32 %v2968_v24, %v421_v6  ;;  %v3633_v33 = vshrl.u32 %v5233_v32, 7  ;;  %p2624_p1 = scmp.ne.s32.totalorder %s3397_s21, 3 }
  0x29   : > { %542 = vmatprep.subr.bf16.mxu1 %v432_v15  ;;  %615 = vmatprep.subr.bf16.mxu0 %v438_v19  ;;  %v450_v26 = vand.u32 %v2967_v23, %v421_v6  ;;  %v2964_v29 = vld [vmem:[%s3528_s26 + $0x10] sm:$0xff]   ;;  %v2965_v30 = vld [vmem:[%s5226_s1 + $0x20] ss:$44 sps:$4 sm:$0x1f]  }
  0x2a   : > { %v447_v31 = vand.u32 %v2965_v30, %v421_v6  ;;  %5302 = vst [vmem:[#allocation6_spill] sm:$0xff] %v3633_v33  ;;  %v3636_v34 = vsub.s32 0, %v3633_v33  ;;  %v3641_v35 = vld [vmem:[%s5227_s2] sm:$0xff]  ;;  %v3644_v36 = vsub.s32 1, %v3633_v33  ;;  %v3667_v49 = vsub.s32 2, %v3633_v33 }
  0x2b   : > { %2512 = vmatmul.mubr.msk.bf16.vlgmr.msra.gmra.mxu0 %vm405_vm3, %v3544_v10  ;;  %2515 = vmatmul.mubr.msk.bf16.vlgmr.msra.gmra.mxu1 %vm405_vm3, %v3547_v11  ;;  %v5231_v63 = vsub.s32 3, %v3633_v33 }
  0x2c   : > { %543 = vmatpush1.bf16.msra.mxu1 %v429_v16  ;;  %616 = vmatpush1.bf16.msra.mxu0 %v435_v18  ;;  %5303 = vst [vmem:[#allocation7_spill] sm:$0xff] %v3636_v34  ;;  %5304 = vst [vmem:[#allocation8_spill] sm:$0xff] %v3644_v36  ;;  %v3648_v37 = vrot.slane %v3641_v35, %v3636_v34  ;;  %v3652_v38 = vrot.slane %v3641_v35, %v3644_v36  ;;  %v5326_v36 = vsub.s32 6, %v3633_v33 }
  0x2d   : > { %497 = vmatprep.mubr.bf16.mxu0 %v3417_v7  ;;  %560 = vmatprep.mubr.bf16.mxu1 %v3417_v7  ;;  %5305 = vst [vmem:[#allocation9_spill] sm:$0xff] %v3667_v49  ;;  %v3687_v61 = vrot.slane %v3641_v35, %v3667_v49  ;;  %v3703_v8 = vrot.slane %v3641_v35, %v5231_v63 }
  0x2e   : > { %688 = vmatprep.subr.bf16.mxu1 %v444_v22  ;;  %761 = vmatprep.subr.bf16.mxu0 %v450_v26 }
  0x33   : > { %2513 = vmatmul.mubr.msk.bf16.gmra.mxu0 %vm405_vm3, %v2960_v25  ;;  %2516 = vmatmul.mubr.msk.bf16.vlgmr.msra.gmra.mxu1 %vm405_vm3, %v3544_v10 }
  0x34   : > { %689 = vmatpush1.bf16.msra.mxu1 %v441_v27  ;;  %507 = vmatprep.mubr.bf16.mxu0 %v3417_v7 }
  0x35   : > { %570 = vmatprep.mubr.bf16.mxu1 %v3417_v7  ;;  %2825 = vmatprep.subr.bf16.mxu1 %v453_v28 }
  0x3b   : > { %2514 = vmatmul.mubr.msk.bf16.gmra.mxu0 %vm405_vm3, %v2964_v29  ;;  %2517 = vmatmul.mubr.msk.bf16.gmra.mxu1 %vm405_vm3, %v2960_v25 }
  0x3c   : > { %580 = vmatprep.mubr.bf16.mxu1 %v3417_v7  ;;  %633 = vmatprep.mubr.bf16.mxu0 %v3417_v7 }
  0x43   : > { %2518 = vmatmul.mubr.msk.bf16.gmra.mxu1 %vm405_vm3, %v2964_v29  ;;  %2520 = vmatmul.mubr.msk.bf16.vlgmr.msra.gmra.mxu0 %vm405_vm3, %v3544_v10 }
  0x44   : > { %762 = vmatpush1.bf16.msra.mxu0 %v447_v31  ;;  %590 = vmatprep.mubr.bf16.mxu1 %v3417_v7 }
  0x45   : > { %643 = vmatprep.mubr.bf16.mxu0 %v3417_v7 }
  0x4b   : > { %2519 = vmatmul.mubr.msk.bf16.gmra.mxu1 %vm405_vm3, %v3547_v11  ;;  %2521 = vmatmul.mubr.msk.bf16.gmra.mxu0 %vm405_vm3, %v2960_v25 }
  0x4c   : > { %653 = vmatprep.mubr.bf16.mxu0 %v3417_v7  ;;  %706 = vmatprep.mubr.bf16.mxu1 %v3417_v7 }
  0x53   : > { %2522 = vmatmul.mubr.msk.bf16.gmra.mxu0 %vm405_vm3, %v2964_v29  ;;  %2524 = vmatmul.mubr.msk.bf16.vlgmr.msra.gmra.mxu1 %vm405_vm3, %v3544_v10 }
  0x54   : > { %2826 = vmatpush3.bf16.msra.mxu1 %v453_v28  ;;  %663 = vmatprep.mubr.bf16.mxu0 %v3417_v7 }
  0x55   : > { %716 = vmatprep.mubr.bf16.mxu1 %v3417_v7 }
  0x5b   : > { %2523 = vmatmul.mubr.msk.bf16.gmra.mxu0 %vm405_vm3, %v3547_v11  ;;  %2525 = vmatmul.mubr.msk.bf16.gmra.mxu1 %vm405_vm3, %v2960_v25 }
  0x5c   : > { %726 = vmatprep.mubr.bf16.mxu1 %v3417_v7  ;;  %779 = vmatprep.mubr.bf16.mxu0 %v3417_v7 }
  0x63   : > { %2526 = vmatmul.mubr.msk.bf16.gmra.mxu1 %vm405_vm3, %v2964_v29  ;;  %2528 = vmatmul.mubr.msk.bf16.vlgmr.msra.gmra.mxu0 %vm405_vm3, %v3544_v10 }
  0x64   : > { %736 = vmatprep.mubr.bf16.mxu1 %v3417_v7  ;;  %789 = vmatprep.mubr.bf16.mxu0 %v3417_v7 }
  0x6b   : > { %2527 = vmatmul.mubr.msk.bf16.gmra.mxu1 %vm405_vm3, %v3547_v11  ;;  %2529 = vmatmul.mubr.msk.bf16.gmra.mxu0 %vm405_vm3, %v2960_v25 }
  0x6c   : > { %799 = vmatprep.mubr.bf16.mxu0 %v3417_v7  ;;  %2827 = vmatprep.mubr.msk.bf16.mxu1 %vm405_vm3, %v3544_v10 }
  0x73   : > { %2530 = vmatmul.mubr.msk.bf16.gmra.mxu0 %vm405_vm3, %v2964_v29  ;;  %2828 = vmatmul.mubr.msk.bf16.vlgmr.msra.gmra.mxu1 %vm405_vm3, %v2960_v25 }
  0x74   : > { %809 = vmatprep.mubr.bf16.mxu0 %v3417_v7  ;;  %2831 = vmatprep.mubr.msk.bf16.mxu1 %vm405_vm3, %v2964_v29 }
  0x7b   : > { %2531 = vmatmul.mubr.msk.bf16.gmra.mxu0 %vm405_vm3, %v3547_v11  ;;  %2832 = vmatmul.mubr.msk.bf16.gmra.mxu1 %vm405_vm3, %v3547_v11 }
  0xeb   : > { %v489_v39 = vpop.f32.mrf.mxu0  ;;  %v519_v40 = vpop.f32.mrf.mxu1 }
  0xec   : > { %v3655_v41 = vadd.f32 %v489_v39, %v3648_v37  ;;  %v3658_v42 = vadd.f32 %v519_v40, %v3648_v37 }
  0xed   : > { %v491_v43 = vpop.f32.mrf.mxu0  ;;  %v521_v44 = vpop.f32.mrf.mxu1 }
  0xee   : > { %v3661_v45 = vadd.f32 %v491_v43, %v3652_v38  ;;  %v3664_v46 = vadd.f32 %v521_v44, %v3652_v38  ;;  %v2536_v50 = vmul.f32 -1.442695, %v3655_v41  ;;  %v2602_v52 = vmul.f32 -1.442695, %v3658_v42 }
  0xef   : > { %v493_v47 = vpop.f32.mrf.mxu0  ;;  %v523_v48 = vpop.f32.mrf.mxu1 }
  0xf0   : > { %v3671_v51 = vadd.f32 %v493_v47, %v3648_v37  ;;  %v3675_v53 = vadd.f32 %v523_v48, %v3648_v37  ;;  %v2537_v56 = vmul.f32 -1.442695, %v3661_v45  ;;  %v2603_v58 = vmul.f32 -1.442695, %v3664_v46 }
  0xf1   : > { %v495_v54 = vpop.f32.mrf.mxu0  ;;  %v525_v55 = vpop.f32.mrf.mxu1  ;;  %2969 = vpow2.f32 %v2536_v50 }
  0xf2   : > { %v3679_v57 = vadd.f32 %v495_v54, %v3652_v38  ;;  %v3683_v59 = vadd.f32 %v525_v55, %v3652_v38  ;;  %v2547_v0 = vmul.f32 -1.442695, %v3671_v51  ;;  %2971 = vpow2.f32 %v2602_v52 }
  0xf3   : > { %v499_v60 = vpop.f32.mrf.mxu0  ;;  %v562_v62 = vpop.f32.mrf.mxu1  ;;  %v2613_v1 = vmul.f32 -1.442695, %v3675_v53  ;;  %2973 = vpow2.f32 %v2537_v56 }
  0xf4   : > { %v3693_v2 = vadd.f32 %v499_v60, %v3648_v37  ;;  %v2548_v5 = vmul.f32 -1.442695, %v3679_v57  ;;  %2975 = vpow2.f32 %v2603_v58  ;;  %v2614_v6 = vmul.f32 -1.442695, %v3683_v59 }
  0xf5   : > { %v501_v3 = vpop.f32.mrf.mxu0  ;;  %v564_v4 = vpop.f32.mrf.mxu1  ;;  %v3698_v7 = vadd.f32 %v562_v62, %v3687_v61  ;;  %2977 = vpow2.f32 %v2547_v0 }
  0xf6   : > { %2979 = vpow2.f32 %v2613_v1  ;;  %v2558_v11 = vmul.f32 -1.442695, %v3693_v2  ;;  %v3707_v12 = vadd.f32 %v501_v3, %v3652_v38  ;;  %v3711_v16 = vadd.f32 %v564_v4, %v3703_v8 }
  0xf7   : > { %5306 = vst [vmem:[#allocation10_spill] sm:$0xff] %v3698_v7  ;;  %v503_v9 = vpop.f32.mrf.mxu0  ;;  %v566_v10 = vpop.f32.mrf.mxu1  ;;  %2981 = vpow2.f32 %v2548_v5  ;;  %v2538_v15 = vmul.f32 -1.442695, %v3698_v7 }
  0xf8   : > { %2983 = vpow2.f32 %v2614_v6  ;;  %5307 = vst [vmem:[#allocation11_spill] sm:$0xff] %v3711_v16  ;;  %v3716_v19 = vadd.f32 %v503_v9, %v3648_v37  ;;  %v2559_v20 = vmul.f32 -1.442695, %v3707_v12  ;;  %v3720_v21 = vadd.f32 %v566_v10, %v3687_v61 }
  0xf9   : > { %v505_v13 = vpop.f32.mrf.mxu0  ;;  %v568_v14 = vpop.f32.mrf.mxu1  ;;  %2985 = vpow2.f32 %v2558_v11  ;;  %v2539_v25 = vmul.f32 -1.442695, %v3711_v16 }
  0xfa   : > { %5308 = vst [vmem:[#allocation12_spill] sm:$0xff] %v3720_v21  ;;  %v3725_v24 = vadd.f32 %v505_v13, %v3652_v38  ;;  %2987 = vpow2.f32 %v2538_v15  ;;  %v3729_v26 = vadd.f32 %v568_v14, %v3703_v8  ;;  %v2569_v29 = vmul.f32 -1.442695, %v3716_v19 }
  0xfb   : > { %v509_v17 = vpop.f32.mrf.mxu0  ;;  %v3713_v18 = vpop.f32.mrf.mxu1  ;;  %2989 = vpow2.f32 %v2559_v20  ;;  %v2549_v31 = vmul.f32 -1.442695, %v3720_v21 }
  0xfc   : > { %5309 = vst [vmem:[#allocation13_spill] sm:$0xff] %v3729_v26  ;;  %v2570_v44 = vmul.f32 -1.442695, %v3725_v24  ;;  %2991 = vpow2.f32 %v2539_v25  ;;  %v2550_v48 = vmul.f32 -1.442695, %v3729_v26  ;;  %v3752_v11 = vadd.f32 %v509_v17, %v3648_v37 }
  0xfd   : > { %v511_v22 = vpop.f32.mrf.mxu0  ;;  %v3722_v23 = vpop.f32.mrf.mxu1  ;;  %2993 = vpow2.f32 %v2569_v29 }
  0xfe   : > { %v2970_v30 = vpop.eup %2969  ;;  %2995 = vpow2.f32 %v2549_v31  ;;  %v3759_v29 = vadd.f32 %v511_v22, %v3652_v38  ;;  %v2580_v17 = vmul.f32 -1.442695, %v3752_v11 }
  0xff   : > { %v513_v27 = vpop.f32.mrf.mxu0  ;;  %v3731_v28 = vpop.f32.mrf.mxu1  ;;  %v1149_v55 = vadd.f32 1.0, %v2970_v30  ;;  %2997 = vpow2.f32 %v2570_v44 }
 0x100   : > { %v2972_v43 = vpop.eup %2971  ;;  %2999 = vpow2.f32 %v2550_v48  ;;  %v3765_v44 = vadd.f32 %v513_v27, %v3648_v37  ;;  %v2581_v22 = vmul.f32 -1.442695, %v3759_v29  ;;  %v3777_v37 = vadd.f32 %v3713_v18, %v3687_v61 }
 0x101   : > { %v515_v39 = vpop.f32.mrf.mxu0  ;;  %v3735_v40 = vpop.f32.mrf.mxu1  ;;  %v1215_v58 = vadd.f32 1.0, %v2972_v43  ;;  %3001 = vrcp.f32 %v1149_v55 }
 0x102   : > { %v2974_v47 = vpop.eup %2973  ;;  %v3771_v55 = vadd.f32 %v515_v39, %v3652_v38  ;;  %5310 = vst [vmem:[#allocation14_spill] sm:$0xff] %v3777_v37  ;;  %v2591_v27 = vmul.f32 -1.442695, %v3765_v44  ;;  %v3784_v38 = vadd.f32 %v3722_v23, %v3703_v8  ;;  %v5232_v39 = vsub.s32 4, %v3633_v33 }
 0x103   : > { %v3739_v50 = vpop.f32.mrf.mxu1  ;;  %v3741_v52 = vpop.f32.mrf.mxu0  ;;  %v1150_v1 = vadd.f32 1.0, %v2974_v47  ;;  %3003 = vrcp.f32 %v1215_v58 }
 0x104   : > { %v2976_v54 = vpop.eup %2975  ;;  %5311 = vst [vmem:[#allocation15_spill] sm:$0xff] %v3784_v38  ;;  %v2592_v18 = vmul.f32 -1.442695, %v3771_v55  ;;  %v3822_v63 = vadd.f32 %v3739_v50, %v3687_v61 }
 0x105   : > { %v2978_v56 = vpop.eup %2977  ;;  %v3743_v60 = vpop.f32.mrf.mxu1  ;;  %v1216_v4 = vadd.f32 1.0, %v2976_v54  ;;  %3005 = vrcp.f32 %v1150_v1 }
 0x106   : > { %v3745_v62 = vpop.f32.mrf.mxu0  ;;  %v2980_v0 = vpop.eup %2979  ;;  %v1160_v10 = vadd.f32 1.0, %v2978_v56  ;;  %5314 = vst [vmem:[#allocation18_spill] sm:$0xff] %v3822_v63 }
 0x107   : > { %v2982_v3 = vpop.eup %2981  ;;  %v3747_v5 = vpop.f32.mrf.mxu1  ;;  %v1226_v13 = vadd.f32 1.0, %v2980_v0  ;;  %3007 = vrcp.f32 %v1216_v4 }
 0x108   : > { %v3749_v6 = vpop.f32.mrf.mxu0  ;;  %v2984_v9 = vpop.eup %2983  ;;  %v1161_v25 = vadd.f32 1.0, %v2982_v3  ;;  %3009 = vrcp.f32 %v1160_v10  ;;  %v3789_v10 = vadd.f32 %v3731_v28, %v3687_v61 }
 0x109   : > { %v3754_v14 = vpop.f32.mrf.mxu1  ;;  %v2986_v20 = vpop.eup %2985  ;;  %v1227_v30 = vadd.f32 1.0, %v2984_v9  ;;  %3011 = vrcp.f32 %v1226_v13 }
 0x10a   : > { %v3756_v15 = vpop.f32.mrf.mxu0  ;;  %v2988_v43 = vpop.eup %2987  ;;  %v1171_v48 = vadd.f32 1.0, %v2986_v20  ;;  %3013 = vrcp.f32 %v1161_v25  ;;  %5312 = vst [vmem:[#allocation16_spill] sm:$0xff] %v3789_v10 }
 0x10b   : > { %v3767_v47 = vpop.f32.mrf.mxu1  ;;  %v2990_v54 = vpop.eup %2989  ;;  %3015 = vrcp.f32 %v1227_v30  ;;  %v1151_v58 = vadd.f32 1.0, %v2988_v43  ;;  %v3796_v30 = vadd.f32 %v3735_v40, %v3703_v8  ;;  %v2560_v43 = vmul.f32 -1.442695, %v3777_v37 }
 0x10c   : > { %v3761_v31 = vpop.f32.mrf.mxu0  ;;  %v2992_v0 = vpop.eup %2991  ;;  %3017 = vpow2.f32 %v2580_v17  ;;  %v1172_v4 = vadd.f32 1.0, %v2990_v54  ;;  %v3809_v54 = vrot.slane %v3641_v35, %v5232_v39 }
 0x10d   : > { %v3780_v1 = vpop.f32.mrf.mxu1  ;;  %v2994_v3 = vpop.eup %2993  ;;  %3019 = vrcp.f32 %v1171_v48  ;;  %v1152_v25 = vadd.f32 1.0, %v2992_v0  ;;  %5313 = vst [vmem:[#allocation17_spill] sm:$0xff] %v3796_v30  ;;  %v2561_v48 = vmul.f32 -1.442695, %v3784_v38 }
 0x10e   : > { %v3773_v56 = vpop.f32.mrf.mxu0  ;;  %v2996_v9 = vpop.eup %2995  ;;  %3021 = vpow2.f32 %v2581_v22  ;;  %v1182_v32 = vadd.f32 1.0, %v2994_v3 }
 0x10f   : > { %v2998_v20 = vpop.eup %2997  ;;  %3023 = vrcp.f32 %v1151_v58  ;;  %v3801_v17 = vpop.f32.mrf.mxu1  ;;  %v2571_v58 = vmul.f32 -1.442695, %v3789_v10  ;;  %v3832_v10 = vadd.f32 %v3741_v52, %v3809_v54  ;;  %v1162_v37 = vadd.f32 1.0, %v2996_v9 }
 0x110   : > { %v3792_v13 = vpop.f32.mrf.mxu0  ;;  %v3798_v23 = vpop.eup %2999  ;;  %3025 = vpow2.f32 %v2591_v27  ;;  %v3848_v52 = vadd.f32 %v3743_v60, %v3703_v8 }
 0x111   : > { %v3803_v28 = vpop.eup %3001  ;;  %3027 = vrcp.f32 %v1172_v4  ;;  %v2572_v4 = vmul.f32 -1.442695, %v3796_v30  ;;  %v3826_v40 = vpop.f32.mrf.mxu1  ;;  %5315 = vst [vmem:[#allocation19_spill] sm:$0xff] %v3832_v10  ;;  %v2540_v9 = vmul.f32 -1.442695, %v3832_v10 }
 0x112   : > { %v3812_v22 = vpop.eup %3003  ;;  %3029 = vpow2.f32 %v2592_v18  ;;  %v3815_v0 = vpop.f32.mrf.mxu0  ;;  %v1183_v18 = vadd.f32 1.0, %v2998_v20  ;;  %v2582_v20 = vmul.f32 -1.442695, %v3822_v63  ;;  %5317 = vst [vmem:[#allocation20_spill] sm:$0xff] %v3848_v52  ;;  %v2583_v21 = vmul.f32 -1.442695, %v3848_v52 }
 0x113   : > { %v3817_v27 = vpop.eup %3005  ;;  %3031 = vrcp.f32 %v1152_v25  ;;  %v5316_v25 = vsub.s32 5, %v3633_v33 }
 0x114   : > { %v3824_v39 = vpop.eup %3007  ;;  %3033 = vpow2.f32 %v2560_v43  ;;  %v3841_v3 = vpop.f32.mrf.mxu0 }
 0x115   : > { %v3828_v38 = vpop.eup %3009  ;;  %3035 = vpow2.f32 %v2561_v48  ;;  %v3837_v30 = vrot.slane %v3641_v35, %v5316_v25  ;;  %v3852_v25 = vpop.f32.mrf.mxu1 }
 0x116   : > { %v3839_v50 = vpop.eup %3011  ;;  %3037 = vpow2.f32 %v2571_v58  ;;  %v3859_v26 = vpop.f32.mrf.mxu0 }
 0x117   : > { %v3843_v43 = vpop.eup %3013  ;;  %3039 = vpow2.f32 %v2572_v4  ;;  %v3857_v58 = vadd.f32 %v3745_v62, %v3837_v30  ;;  %v3869_v10 = vpop.f32.mrf.mxu1  ;;  %v3883_v62 = vadd.f32 %v3756_v15, %v3837_v30 }
 0x118   : > { %v3850_v48 = vpop.eup %3015  ;;  %3041 = vrcp.f32 %v1182_v32 }
 0x119   : > { %v3018_v49 = vpop.eup %3017  ;;  %3043 = vrcp.f32 %v1183_v18  ;;  %5318 = vst [vmem:[#allocation21_spill] sm:$0xff] %v3857_v58  ;;  %v3866_v18 = vadd.f32 %v3747_v5, %v3687_v61  ;;  %v3879_v5 = vadd.f32 %v3754_v14, %v3703_v8  ;;  %5323 = vst [vmem:[#allocation26_spill] sm:$0xff] %v3883_v62  ;;  %v3895_v52 = vpop.f32.mrf.mxu1 }
 0x11a   : > { %v3020_v4 = vpop.eup %3019  ;;  %3045 = vrcp.f32 %v1162_v37  ;;  %v1193_v63 = vadd.f32 1.0, %v3018_v49  ;;  %v2541_v49 = vmul.f32 -1.442695, %v3857_v58 }
 0x11b   : > { %v3022_v60 = vpop.eup %3021  ;;  %3047 = vpow2.f32 %v2582_v20  ;;  %5320 = vst [vmem:[#allocation23_spill] sm:$0xff] %v3866_v18  ;;  %v3874_v20 = vadd.f32 %v3749_v6, %v3809_v54  ;;  %5322 = vst [vmem:[#allocation25_spill] sm:$0xff] %v3879_v5  ;;  %v3890_v6 = vadd.f32 %v3767_v47, %v3687_v61  ;;  %v2593_v14 = vmul.f32 -1.442695, %v3866_v18 }
 0x11c   : > { %v3862_v32 = vpop.eup %3023  ;;  %3049 = vrcp.f32 %v1193_v63  ;;  %v1194_v16 = vadd.f32 1.0, %v3022_v60  ;;  %v2594_v47 = vmul.f32 -1.442695, %v3879_v5 }
 0x11d   : > { %5319 = vst [vmem:[#allocation22_spill] sm:$0xff] %v3862_v32  ;;  %v3026_v37 = vpop.eup %3025  ;;  %3051 = vpow2.f32 %v2540_v9  ;;  %5321 = vst [vmem:[#allocation24_spill] sm:$0xff] %v3874_v20  ;;  %v3885_v9 = vpop.f32.mrf.mxu0  ;;  %v1163_v32 = vadd.f32 1.0, %v3798_v23  ;;  %v2551_v7 = vmul.f32 -1.442695, %v3874_v20  ;;  %v1413_v20 = vmul.f32 %v3803_v28, %v3655_v41 }
 0x11e   : > { %v3028_v63 = vpop.eup %3027  ;;  %3053 = vrcp.f32 %v1194_v16  ;;  %v1204_v60 = vadd.f32 1.0, %v3026_v37  ;;  %5324 = vst [vmem:[#allocation27_spill] sm:$0xff] %v3890_v6  ;;  %v3929_v28 = vmul.f32 %v3812_v22, %v3658_v42  ;;  %v1414_v42 = vmul.f32 %v3817_v27, %v3661_v45 }
 0x11f   : > { %v3030_v58 = vpop.eup %3029  ;;  %3055 = vpow2.f32 %v2583_v21  ;;  %v3901_v21 = vrot.slane %v3641_v35, %v5326_v36  ;;  %v2604_v36 = vmul.f32 -1.442695, %v3890_v6 }
 0x120   : > { %v3892_v16 = vpop.eup %3031  ;;  %3057 = vrcp.f32 %v1204_v60  ;;  %v1205_v37 = vadd.f32 1.0, %v3030_v58  ;;  %v2552_v60 = vmul.f32 -1.442695, %v3883_v62  ;;  %v5327_v58 = vsub.s32 7, %v3633_v33 }
 0x121   : > { %5325 = vst [vmem:[#allocation28_spill] sm:$0xff] %v3892_v16  ;;  %v3034_v15 = vpop.eup %3033  ;;  %3059 = vpow2.f32 %v2541_v49  ;;  %v3910_v16 = vpop.f32.mrf.mxu0  ;;  %v1424_v33 = vmul.f32 %v3828_v38, %v3671_v51  ;;  %v1435_v51 = vmul.f32 %v3020_v4, %v3693_v2 }
 0x122   : > { %v3036_v23 = vpop.eup %3035  ;;  %3061 = vrcp.f32 %v1205_v37  ;;  %v3908_v18 = vrot.slane %v3641_v35, %v5327_v58  ;;  %v3917_v37 = vadd.f32 %v3761_v31, %v3809_v54  ;;  %v1173_v62 = vadd.f32 1.0, %v3034_v15  ;;  %v3925_v58 = vpop.f32.mrf.mxu1 }
 0x123   : > { %v3038_v49 = vpop.eup %3037  ;;  %3063 = vrcp.f32 %v1163_v32  ;;  %v3923_v35 = vadd.f32 %v3780_v1, %v3703_v8  ;;  %v1425_v31 = vmul.f32 %v3843_v43, %v3679_v57  ;;  %v1174_v32 = vadd.f32 1.0, %v3036_v23 }
 0x124   : > { %v3040_v5 = vpop.eup %3039  ;;  %3065 = vpow2.f32 %v2593_v14  ;;  %v1184_v38 = vadd.f32 1.0, %v3038_v49  ;;  %v3936_v1 = vadd.f32 %v3773_v56, %v3837_v30  ;;  %v3938_v14 = vpop.f32.mrf.mxu0  ;;  %v1436_v57 = vmul.f32 %v3028_v63, %v3707_v12 }
 0x125   : > { %v3042_v41 = vpop.eup %3041  ;;  %3067 = vpow2.f32 %v2551_v7  ;;  %v1185_v22 = vadd.f32 1.0, %v3040_v5  ;;  %v1503_v43 = vadd.f32 %v1424_v33, %v1413_v20  ;;  %v3948_v56 = vadd.f32 %v3801_v17, %v3687_v61  ;;  %v3950_v4 = vpop.f32.mrf.mxu1 }
 0x126   : > { %v3044_v6 = vpop.eup %3043  ;;  %3069 = vpow2.f32 %v2594_v47  ;;  %v1446_v2 = vmul.f32 %v3042_v41, %v3716_v19  ;;  %v1516_v47 = vadd.f32 %v1425_v31, %v1414_v42  ;;  %v2562_v45 = vmul.f32 -1.442695, %v3917_v37 }
 0x127   : > { %v3940_v15 = vpop.eup %3045  ;;  %3071 = vpow2.f32 %v2552_v60  ;;  %v1447_v49 = vmul.f32 %v3044_v6, %v3725_v24  ;;  %v1504_v27 = vadd.f32 %v1503_v43, %v1435_v51  ;;  %v2605_v19 = vmul.f32 -1.442695, %v3923_v35  ;;  %v3965_v60 = vpop.f32.mrf.mxu1 }
 0x128   : > { %v3048_v7 = vpop.eup %3047  ;;  %3073 = vrcp.f32 %v1173_v62  ;;  %v3956_v62 = vpop.f32.mrf.mxu0  ;;  %v1517_v17 = vadd.f32 %v1516_v47, %v1436_v57  ;;  %v2563_v20 = vmul.f32 -1.442695, %v3936_v1  ;;  %v3961_v24 = vadd.f32 %v3792_v13, %v3809_v54 }
 0x129   : > { %v3050_v23 = vpop.eup %3049  ;;  %3075 = vrcp.f32 %v1174_v32  ;;  %v1505_v5 = vadd.f32 %v1504_v27, %v1446_v2  ;;  %v1195_v32 = vadd.f32 1.0, %v3048_v7  ;;  %v3969_v51 = vadd.f32 %v3826_v40, %v3703_v8 }
 0x12a   : > { %v3052_v12 = vpop.eup %3051  ;;  %v1457_v33 = vmul.f32 %v3050_v23, %v3752_v11  ;;  %3077 = vrcp.f32 %v1184_v38  ;;  %5328 = vst [vmem:[#allocation29_spill] sm:$0xff] %v3961_v24  ;;  %v2615_v11 = vmul.f32 -1.442695, %v3948_v56  ;;  %v1518_v31 = vadd.f32 %v1517_v17, %v1447_v49 }
 0x12b   : > { %v3054_v61 = vpop.eup %3053  ;;  %3079 = vrcp.f32 %v1185_v22  ;;  %v1153_v57 = vadd.f32 1.0, %v3052_v12  ;;  %v2573_v43 = vmul.f32 -1.442695, %v3961_v24  ;;  %v3977_v7 = vadd.f32 %v3815_v0, %v3837_v30 }
 0x12c   : > { %v3056_v63 = vpop.eup %3055  ;;  %v1458_v6 = vmul.f32 %v3054_v61, %v3759_v29  ;;  %3081 = vpow2.f32 %v2604_v36  ;;  %v1506_v13 = vadd.f32 %v1505_v5, %v1457_v33  ;;  %v3972_v29 = vpop.f32.mrf.mxu0  ;;  %v1480_v49 = vmul.f32 %v3824_v39, %v3664_v46 }
 0x12d   : > { %v3058_v41 = vpop.eup %3057  ;;  %3083 = vpow2.f32 %v2562_v45  ;;  %v1196_v22 = vadd.f32 1.0, %v3056_v63  ;;  %v1490_v45 = vmul.f32 %v3839_v50, %v3675_v53  ;;  %v2616_v0 = vmul.f32 -1.442695, %v3969_v51 }
 0x12e   : > { %v3060_v38 = vpop.eup %3059  ;;  %v1468_v42 = vmul.f32 %v3058_v41, %v3765_v44  ;;  %3085 = vpow2.f32 %v2605_v19  ;;  %v1519_v8 = vadd.f32 %v1518_v31, %v1458_v6  ;;  %v3982_v44 = vpop.f32.mrf.mxu1  ;;  %v1491_v17 = vmul.f32 %v3850_v48, %v3683_v59 }
 0x12f   : > { %v3062_v36 = vpop.eup %3061  ;;  %3087 = vpow2.f32 %v2563_v20  ;;  %v1154_v19 = vadd.f32 1.0, %v3060_v38  ;;  %v2574_v46 = vmul.f32 -1.442695, %v3977_v7  ;;  %v3997_v53 = vadd.f32 %v3841_v3, %v3809_v54 }
 0x130   : > { %v3979_v2 = vpop.eup %3063  ;;  %v1507_v40 = vadd.f32 %v1506_v13, %v1468_v42  ;;  %v1469_v23 = vmul.f32 %v3062_v36, %v3771_v55  ;;  %3089 = vpow2.f32 %v2615_v11  ;;  %v3990_v55 = vpop.f32.mrf.mxu0  ;;  %v4005_v59 = vadd.f32 %v3852_v25, %v3901_v21 }
 0x131   : > { %v3066_v47 = vpop.eup %3065  ;;  %3091 = vrcp.f32 %v1195_v32  ;;  %5329 = vst [vmem:[#allocation30_spill] sm:$0xff] %v3997_v53  ;;  %v3999_v63 = vpop.f32.mrf.mxu1  ;;  %v4009_v48 = vadd.f32 %v3859_v26, %v3837_v30  ;;  %v4019_v25 = vadd.f32 %v3869_v10, %v3908_v18  ;;  %v2584_v36 = vmul.f32 -1.442695, %v3997_v53 }
 0x132   : > { %v3068_v12 = vpop.eup %3067  ;;  %v1508_v27 = vadd.f32 %v1507_v40, %v3929_v28  ;;  %v1520_v33 = vadd.f32 %v1519_v8, %v1469_v23  ;;  %3093 = vrcp.f32 %v1153_v57  ;;  %v1206_v28 = vadd.f32 1.0, %v3066_v47  ;;  %5330 = vst [vmem:[#allocation31_spill] sm:$0xff] %v4005_v59  ;;  %v4013_v32 = vpop.f32.mrf.mxu0 }
 0x133   : > { %v3070_v61 = vpop.eup %3069  ;;  %3095 = vpow2.f32 %v2573_v43  ;;  %v1164_v6 = vadd.f32 1.0, %v3068_v12  ;;  %5331 = vst [vmem:[#allocation32_spill] sm:$0xff] %v4009_v48  ;;  %5332 = vst [vmem:[#allocation33_spill] sm:$0xff] %v4019_v25  ;;  %v2542_v8 = vmul.f32 -1.442695, %v4005_v59 }
 0x134   : > { %v3072_v39 = vpop.eup %3071  ;;  %v1509_v50 = vadd.f32 %v1508_v27, %v1490_v45  ;;  %v1521_v20 = vadd.f32 %v1520_v33, %v1480_v49  ;;  %3097 = vrcp.f32 %v1196_v22  ;;  %v1207_v31 = vadd.f32 1.0, %v3070_v61  ;;  %v4024_v22 = vpop.f32.mrf.mxu1 }
 0x135   : > { %v4001_v5 = vpop.eup %3073  ;;  %3099 = vpow2.f32 %v2616_v0  ;;  %v1165_v13 = vadd.f32 1.0, %v3072_v39  ;;  %v2585_v10 = vmul.f32 -1.442695, %v4009_v48  ;;  %v4028_v49 = vpop.f32.mrf.mxu0  ;;  %v2543_v0 = vmul.f32 -1.442695, %v4019_v25 }
 0x136   : > { %v4011_v3 = vpop.eup %3075  ;;  %v1510_v11 = vrot.slane %v1509_v50, 4  ;;  %v1522_v41 = vadd.f32 %v1521_v20, %v1491_v17  ;;  %3101 = vrcp.f32 %v1154_v19  ;;  %v4031_v61 = vpop.f32.mrf.mxu1  ;;  %v4035_v39 = vadd.f32 %v3885_v9, %v3809_v54 }
 0x137   : > { %v4015_v38 = vpop.eup %3077  ;;  %3103 = vpow2.f32 %v2574_v46 }
 0x138   : > { %v4021_v42 = vpop.eup %3079  ;;  %v1511_v26 = vadd.f32 %v1510_v11, %v1509_v50  ;;  %v1523_v57 = vrot.slane %v1522_v41, 4  ;;  %3105 = vrcp.f32 %v1206_v28  ;;  %5333 = vst [vmem:[#allocation34_spill] sm:$0xff] %v4035_v39  ;;  %v4039_v50 = vadd.f32 %v3895_v52, %v3901_v21 }
 0x139   : > { %v3082_v43 = vpop.eup %3081  ;;  %3107 = vrcp.f32 %v1164_v6  ;;  %v4049_v52 = vadd.f32 %v3910_v16, %v3837_v30 }
 0x13a   : > { %v3084_v40 = vpop.eup %3083  ;;  %v1512_v23 = vrot.slane %v1511_v26, 2  ;;  %v1524_v47 = vadd.f32 %v1523_v57, %v1522_v41  ;;  %3109 = vrcp.f32 %v1207_v31  ;;  %v1217_v19 = vadd.f32 1.0, %v3082_v43  ;;  %5334 = vst [vmem:[#allocation35_spill] sm:$0xff] %v4039_v50  ;;  %v4043_v41 = vpop.f32.mrf.mxu0 }
 0x13b   : > { %v3086_v45 = vpop.eup %3085  ;;  %3111 = vrcp.f32 %v1165_v13  ;;  %v1175_v46 = vadd.f32 1.0, %v3084_v40  ;;  %5335 = vst [vmem:[#allocation36_spill] sm:$0xff] %v4049_v52  ;;  %v2553_v40 = vmul.f32 -1.442695, %v4039_v50  ;;  %v5346_v50 = vld [vmem:[#allocation10_spill] sm:$0xff] }
 0x13c   : > { %v3088_v12 = vpop.eup %3087  ;;  %v1513_v27 = vadd.f32 %v1512_v23, %v1511_v26  ;;  %v1525_v33 = vrot.slane %v1524_v47, 2  ;;  %3113 = vpow2.f32 %v2584_v36  ;;  %v1218_v11 = vadd.f32 1.0, %v3086_v45  ;;  %v4051_v36 = vpop.f32.mrf.mxu1 }
 0x13d   : > { %v3090_v17 = vpop.eup %3089  ;;  %3115 = vpow2.f32 %v2542_v8  ;;  %v1176_v13 = vadd.f32 1.0, %v3088_v12  ;;  %v2595_v8 = vmul.f32 -1.442695, %v4035_v39  ;;  %v4063_v45 = vadd.f32 %v3925_v58, %v3908_v18  ;;  %v4065_v16 = vpop.f32.mrf.mxu0 }
 0x13e   : > { %v4041_v20 = vpop.eup %3091  ;;  %v1514_v28 = vrot.slane %v1513_v27, 1  ;;  %v1526_v6 = vadd.f32 %v1525_v33, %v1524_v47  ;;  %3117 = vpow2.f32 %v2585_v10  ;;  %v1228_v9 = vadd.f32 1.0, %v3090_v17 }
 0x13f   : > { %v4045_v31 = vpop.eup %3093  ;;  %3119 = vpow2.f32 %v2543_v0  ;;  %5338 = vst [vmem:[#allocation39_spill] sm:$0xff] %v4063_v45  ;;  %v4074_v17 = vadd.f32 %v3938_v14, %v3809_v54  ;;  %v2554_v14 = vmul.f32 -1.442695, %v4063_v45 }
 0x140   : > { %v3096_v26 = vpop.eup %3095  ;;  %v1527_v57 = vrot.slane %v1526_v6, 1  ;;  %3121 = vrcp.f32 %v1217_v19  ;;  %v4057_v47 = vadd.f32 %v1514_v28, %v1513_v27  ;;  %v2596_v27 = vmul.f32 -1.442695, %v4049_v52  ;;  %v5350_v52 = vld [vmem:[#allocation12_spill] sm:$0xff] }
 0x141   : > { %v4053_v43 = vpop.eup %3097  ;;  %3123 = vrcp.f32 %v1175_v46  ;;  %v1186_v12 = vadd.f32 1.0, %v3096_v26  ;;  %5339 = vst [vmem:[#allocation40_spill] sm:$0xff] %v4074_v17  ;;  %v4076_v46 = vpop.f32.mrf.mxu1  ;;  %v4092_v26 = vadd.f32 %v3956_v62, %v3837_v30 }
 0x142   : > { %v3100_v23 = vpop.eup %3099  ;;  %5336 = vst [vmem:[#allocation37_spill] sm:$0xff] %v4057_v47  ;;  %v4059_v10 = vadd.f32 %v1527_v57, %v1526_v6  ;;  %3125 = vrcp.f32 %v1218_v11  ;;  %v4082_v6 = vadd.f32 %v3950_v4, %v3901_v21  ;;  %v282_v11 = vld [vmem:[%s5227_s2 + $0x8] sm:$0x7]  ;;  %v4094_v57 = vpop.f32.mrf.mxu0 }
 0x143   : > { %v4067_v0 = vpop.eup %3101  ;;  %3127 = vrcp.f32 %v1176_v13  ;;  %v1229_v28 = vadd.f32 1.0, %v3100_v23  ;;  %5341 = vst [vmem:[#allocation42_spill] sm:$0xff] %v4092_v26  ;;  %v4106_v19 = vrot.slane %v282_v11, %v3636_v34  ;;  %v4108_v62 = vpop.f32.mrf.mxu1  ;;  %v5345_v34 = vld [vmem:[#allocation8_spill] sm:$0xff] }
 0x144   : > { %5337 = vst [vmem:[#allocation38_spill] sm:$0xff] %v4059_v10  ;;  %v3104_v33 = vpop.eup %3103  ;;  %3129 = vrcp.f32 %v1228_v9  ;;  %5340 = vst [vmem:[#allocation41_spill] sm:$0xff] %v4082_v6  ;;  %v2564_v47 = vmul.f32 -1.442695, %v4082_v6  ;;  %v4121_v25 = vrot.slane %v282_v11, %v5345_v34  ;;  %v4123_v45 = vpop.f32.mrf.mxu0  ;;  %v5347_v6 = vld [vmem:[#allocation22_spill] sm:$0xff] }
 0x145   : > { %v4078_v58 = vpop.eup %3105  ;;  %3131 = vpow2.f32 %v2595_v8  ;;  %v1187_v4 = vadd.f32 1.0, %v3104_v33  ;;  %v4100_v8 = vadd.f32 %v3965_v60, %v3908_v18  ;;  %v4117_v60 = vadd.f32 %v3982_v44, %v3901_v21  ;;  %v4134_v48 = vpop.f32.mrf.mxu1 }
 0x146   : > { %v4087_v13 = vpop.eup %3107  ;;  %3133 = vpow2.f32 %v2553_v40  ;;  %v2606_v40 = vmul.f32 -1.442695, %v4074_v17  ;;  %v1415_v59 = vmul.f32 %v5347_v6, %v5346_v50  ;;  %v5348_v17 = vld [vmem:[#allocation11_spill] sm:$0xff]  ;;  %v4142_v6 = vadd.f32 %v3990_v55, %v3837_v30 }
 0x147   : > { %v4096_v9 = vpop.eup %3109  ;;  %3135 = vrcp.f32 %v1186_v12  ;;  %5342 = vst [vmem:[#allocation43_spill] sm:$0xff] %v4100_v8  ;;  %v4113_v12 = vadd.f32 %v3972_v29, %v3809_v54  ;;  %5344 = vst [vmem:[#allocation45_spill] sm:$0xff] %v4117_v60  ;;  %v5349_v54 = vld [vmem:[#allocation28_spill] sm:$0xff]  ;;  %v2565_v44 = vmul.f32 -1.442695, %v4100_v8  ;;  %v4164_v55 = vadd.f32 %v4031_v61, %v3908_v18 }
 0x148   : > { %v4102_v23 = vpop.eup %3111  ;;  %3137 = vpow2.f32 %v2596_v27  ;;  %v2607_v27 = vmul.f32 -1.442695, %v4092_v26  ;;  %v1416_v29 = vmul.f32 %v5349_v54, %v5348_v17  ;;  %v5351_v26 = vld [vmem:[#allocation13_spill] sm:$0xff]  ;;  %v2575_v17 = vmul.f32 -1.442695, %v4117_v60  ;;  %5352 = vst [vmem:[#allocation10_spill] sm:$0xff] %v4142_v6 }
 0x149   : > { %v3114_v10 = vpop.eup %3113  ;;  %3139 = vrcp.f32 %v1229_v28  ;;  %5343 = vst [vmem:[#allocation44_spill] sm:$0xff] %v4113_v12  ;;  %v1427_v34 = vmul.f32 %v3979_v2, %v5351_v26  ;;  %v2617_v50 = vmul.f32 -1.442695, %v4113_v12  ;;  %v4152_v2 = vadd.f32 %v4024_v22, %v3901_v21  ;;  %5356 = vst [vmem:[#allocation12_spill] sm:$0xff] %v4164_v55  ;;  %v5359_v54 = vld [vmem:[#allocation9_spill] sm:$0xff] }
 0x14a   : > { %v3116_v33 = vpop.eup %3115  ;;  %3141 = vpow2.f32 %v2554_v14  ;;  %v1426_v14 = vmul.f32 %v3940_v15, %v5350_v52  ;;  %v1197_v53 = vadd.f32 1.0, %v3114_v10  ;;  %v4148_v15 = vadd.f32 %v3999_v63, %v3908_v18 }
 0x14b   : > { %v3118_v28 = vpop.eup %3117  ;;  %3143 = vrcp.f32 %v1187_v4  ;;  %5354 = vst [vmem:[#allocation11_spill] sm:$0xff] %v4152_v2  ;;  %v4156_v52 = vadd.f32 %v4013_v32, %v4106_v19  ;;  %v1155_v30 = vadd.f32 1.0, %v3116_v33  ;;  %v4168_v63 = vadd.f32 %v4028_v49, %v4121_v25 }
 0x14c   : > { %v3120_v39 = vpop.eup %3119  ;;  %3145 = vpow2.f32 %v2606_v40  ;;  %5353 = vst [vmem:[#allocation22_spill] sm:$0xff] %v4148_v15  ;;  %v3418_v26 = vmov 1966171168   ;;  %v1198_v32 = vadd.f32 1.0, %v3118_v28  ;;  %v4177_v33 = vrot.slane %v282_v11, %v5359_v54 }
 0x14d   : > { %v4136_v24 = vpop.eup %3121  ;;  %3147 = vpow2.f32 %v2564_v47  ;;  %5355 = vst [vmem:[#allocation28_spill] sm:$0xff] %v4156_v52  ;;  %v4158_v47 = vpop.f32.mrf.mxu0  ;;  %5357 = vst [vmem:[#allocation13_spill] sm:$0xff] %v4168_v63  ;;  %v4172_v40 = vunpack.c.l.s4 %v3418_v26  ;;  %v1529_v61 = vadd.f32 %v1426_v14, %v1415_v59  ;;  %v1542_v60 = vadd.f32 %v1427_v34, %v1416_v29 }
 0x14e   : > { %v4144_v4 = vpop.eup %3123  ;;  %3149 = vpow2.f32 %v2607_v27  ;;  %v4174_v27 = vpop.f32.mrf.mxu1  ;;  %v2618_v49 = vmul.f32 -1.442695, %v4142_v6  ;;  %v2576_v12 = vmul.f32 -1.442695, %v4148_v15  ;;  %v2586_v26 = vmul.f32 -1.442695, %v4152_v2 }
 0x14f   : > { %v4160_v10 = vpop.eup %3125  ;;  %3151 = vpow2.f32 %v2565_v44  ;;  %5358 = vst [vmem:[#allocation46_spill] sm:$0xff] %v4172_v40  ;;  %v4185_v28 = vpop.f32.mrf.mxu0  ;;  %v2587_v11 = vmul.f32 -1.442695, %v4164_v55  ;;  %v4189_v59 = vmul.f32 -1.442695, %v4168_v63  ;;  %v4193_v29 = vadd.f32 %v4051_v36, %v3901_v21  ;;  %v5364_v63 = vld [vmem:[#allocation14_spill] sm:$0xff] }
 0x150   : > { %v4170_v22 = vpop.eup %3127  ;;  %3153 = vrcp.f32 %v1197_v53  ;;  %v2544_v53 = vmul.f32 -1.442695, %v4156_v52  ;;  %v1156_v34 = vadd.f32 1.0, %v3120_v39  ;;  %v1437_v52 = vmul.f32 %v4001_v5, %v5364_v63 }
 0x151   : > { %v4179_v44 = vpop.eup %3129  ;;  %3155 = vpow2.f32 %v2617_v50  ;;  %5360 = vst [vmem:[#allocation47_spill] sm:$0xff] %v4193_v29  ;;  %v4199_v50 = vadd.f32 %v4043_v41, %v4106_v19  ;;  %v5366_v41 = vld [vmem:[#allocation15_spill] sm:$0xff]  ;;  %v4221_v15 = vpop.f32.mrf.mxu0 }
 0x152   : > { %v3132_v8 = vpop.eup %3131  ;;  %3157 = vpow2.f32 %v2575_v17  ;;  %v4203_v17 = vadd.f32 %v4076_v46, %v3908_v18  ;;  %v1438_v55 = vmul.f32 %v4011_v3, %v5366_v41  ;;  %v4219_v46 = vadd.f32 %v4108_v62, %v3901_v21 }
 0x153   : > { %v3134_v40 = vpop.eup %3133  ;;  %3159 = vrcp.f32 %v1155_v30  ;;  %5362 = vst [vmem:[#allocation49_spill] sm:$0xff] %v4199_v50  ;;  %v4205_v30 = vpop.f32.mrf.mxu1  ;;  %v1208_v36 = vadd.f32 1.0, %v3132_v8  ;;  %v5368_v8 = vld [vmem:[#allocation16_spill] sm:$0xff]  ;;  %v4237_v41 = vmul.f32 -1.442695, %v4199_v50 }
 0x154   : > { %v4195_v14 = vpop.eup %3135  ;;  %3161 = vrcp.f32 %v1198_v32  ;;  %5363 = vst [vmem:[#allocation50_spill] sm:$0xff] %v4203_v17  ;;  %v4211_v32 = vadd.f32 %v4065_v16, %v4121_v25  ;;  %v1166_v2 = vadd.f32 1.0, %v3134_v40  ;;  %5367 = vst [vmem:[#allocation15_spill] sm:$0xff] %v4219_v46  ;;  %v1448_v63 = vmul.f32 %v4015_v38, %v5368_v8 }
 0x155   : > { %5361 = vst [vmem:[#allocation48_spill] sm:$0xff] %v4195_v14  ;;  %v3138_v54 = vpop.eup %3137  ;;  %3163 = vpow2.f32 %v2618_v49  ;;  %v4226_v16 = vmul.f32 -1.442695, %v4193_v29  ;;  %v4230_v49 = vadd.f32 %v4094_v57, %v4106_v19  ;;  %v4239_v6 = vpop.f32.mrf.mxu1  ;;  %v4242_v8 = vmul.f32 -1.442695, %v4203_v17  ;;  %v5373_v17 = vld [vmem:[#allocation19_spill] sm:$0xff] }
 0x156   : > { %5365 = vst [vmem:[#allocation14_spill] sm:$0xff] %v4211_v32  ;;  %v4213_v39 = vpop.eup %3139  ;;  %3165 = vpow2.f32 %v2576_v12  ;;  %v5371_v12 = vld [vmem:[#allocation17_spill] sm:$0xff]  ;;  %v1209_v40 = vadd.f32 1.0, %v3138_v54  ;;  %v4245_v57 = vmul.f32 -1.442695, %v4211_v32  ;;  %v1543_v14 = vadd.f32 %v1542_v60, %v1438_v55  ;;  %v4250_v54 = vpop.f32.mrf.mxu0 }
 0x157   : > { %v3142_v5 = vpop.eup %3141  ;;  %3167 = vpow2.f32 %v2586_v26  ;;  %5369 = vst [vmem:[#allocation16_spill] sm:$0xff] %v4230_v49  ;;  %v1449_v62 = vmul.f32 %v4021_v42, %v5371_v12  ;;  %v1530_v26 = vadd.f32 %v1529_v61, %v1437_v52  ;;  %v4255_v61 = vmul.f32 -1.442695, %v4230_v49  ;;  %v854_v55 = vpop.f32.mrf.mxu1 }
 0x158   : > { %v4232_v3 = vpop.eup %3143  ;;  %3169 = vrcp.f32 %v1156_v34  ;;  %v1167_v42 = vadd.f32 1.0, %v3142_v5  ;;  %v4248_v34 = vmul.f32 -1.442695, %v4219_v46  ;;  %v1417_v60 = vmul.f32 %v4045_v31, %v5373_v17  ;;  %v5374_v46 = vld [vmem:[#allocation20_spill] sm:$0xff] }
 0x159   : > { %5370 = vst [vmem:[#allocation51_spill] sm:$0xff] %v4232_v3  ;;  %v3146_v38 = vpop.eup %3145  ;;  %3171 = vrcp.f32 %v1208_v36  ;;  %v1531_v50 = vadd.f32 %v1530_v26, %v1448_v63  ;;  %v5372_v3 = vld [vmem:[#allocation18_spill] sm:$0xff]  ;;  %v1544_v32 = vadd.f32 %v1543_v14, %v1449_v62  ;;  %v1460_v63 = vmul.f32 %v4053_v43, %v5374_v46  ;;  %v805_v62 = vpop.f32.mrf.mxu0  ;;  %v5377_v46 = vld [vmem:[#allocation25_spill] sm:$0xff] }
 0x15a   : > { %v3148_v29 = vpop.eup %3147  ;;  %3173 = vrcp.f32 %v1166_v2  ;;  %v1459_v52 = vmul.f32 %v4041_v20, %v5372_v3  ;;  %v1219_v2 = vadd.f32 1.0, %v3146_v38  ;;  %v4265_v20 = vadd.f32 %v4134_v48, %v3908_v18  ;;  %v5375_v3 = vld [vmem:[#allocation23_spill] sm:$0xff]  ;;  %v5376_v38 = vld [vmem:[#allocation24_spill] sm:$0xff] }
 0x15b   : > { %v3150_v12 = vpop.eup %3149  ;;  %3175 = vpow2.f32 %v2544_v53  ;;  %v1177_v26 = vadd.f32 1.0, %v3148_v29  ;;  %v1470_v14 = vmul.f32 %v4078_v58, %v5375_v3  ;;  %v4271_v17 = vadd.f32 %v4123_v45, %v4121_v25  ;;  %v5378_v45 = vld [vmem:[#allocation26_spill] sm:$0xff]  ;;  %v2830_v3 = vpop.f32.mrf.mxu1 }
 0x15c   : > { %v3152_v36 = vpop.eup %3151  ;;  %3177 = vrcp.f32 %v1209_v40  ;;  %v1220_v31 = vadd.f32 1.0, %v3150_v12  ;;  %v1428_v43 = vmul.f32 %v4087_v13, %v5376_v38  ;;  %v4278_v48 = vadd.f32 %v4174_v27, %v3901_v21  ;;  %v5379_v13 = vld [vmem:[#allocation21_spill] sm:$0xff] }
 0x15d   : > { %v4259_v5 = vpop.eup %3153  ;;  %3179 = vpow2.f32 %v2587_v11  ;;  %v1178_v11 = vadd.f32 1.0, %v3152_v36  ;;  %v1532_v58 = vadd.f32 %v1531_v50, %v1459_v52  ;;  %v1429_v12 = vmul.f32 %v4102_v23, %v5378_v45  ;;  %v807_v23 = vpop.f32.mrf.mxu0 }
 0x15e   : > { %v3156_v53 = vpop.eup %3155  ;;  %3181 = vrcp.f32 %v1167_v42  ;;  %v1471_v42 = vmul.f32 %v4096_v9, %v5377_v46  ;;  %v4291_v21 = vmul.f32 -1.442695, %v4265_v20  ;;  %v1545_v50 = vadd.f32 %v1544_v32, %v1460_v63  ;;  %v857_v63 = vpop.f32.mrf.mxu1 }
 0x15f   : > { %v3158_v40 = vpop.eup %3157  ;;  %3183 = vpow2.f32 %v4189_v59  ;;  %v1418_v59 = vmul.f32 %v4067_v0, %v5379_v13  ;;  %v1230_v36 = vadd.f32 1.0, %v3156_v53  ;;  %v4294_v9 = vmul.f32 -1.442695, %v4271_v17 }
 0x160   : > { %v4280_v29 = vpop.eup %3159  ;;  %3185 = vrcp.f32 %v1219_v2  ;;  %v1188_v52 = vadd.f32 1.0, %v3158_v40  ;;  %v4296_v38 = vadd.f32 %v1532_v58, %v1470_v14  ;;  %v4298_v46 = vadd.f32 %v1428_v43, %v1417_v60  ;;  %v811_v58 = vpop.f32.mrf.mxu0 }
 0x161   : > { %v4286_v49 = vpop.eup %3161  ;;  %3187 = vrcp.f32 %v1177_v26  ;;  %v4301_v0 = vmul.f32 -1.442695, %v4278_v48  ;;  %v4303_v53 = vadd.f32 %v1545_v50, %v1471_v42  ;;  %v4305_v45 = vadd.f32 %v1429_v12, %v1418_v59 }
 0x162   : > { %v3164_v27 = vpop.eup %3163  ;;  %3189 = vrcp.f32 %v1220_v31  ;;  %v4310_v32 = vadd.f32 %v4158_v47, %v4106_v19  ;;  %v4316_v31 = vadd.f32 %v4205_v30, %v3908_v18  ;;  %v4320_v40 = vadd.f32 %v4185_v28, %v4121_v25  ;;  %v813_v50 = vpop.f32.mrf.mxu0 }
 0x163   : > { %v3166_v2 = vpop.eup %3165  ;;  %3191 = vrcp.f32 %v1178_v11  ;;  %v1231_v60 = vadd.f32 1.0, %v3164_v27  ;;  %v4326_v47 = vadd.f32 %v4221_v15, %v4106_v19  ;;  %v4330_v11 = vadd.f32 %v4239_v6, %v4177_v33 }
 0x164   : > { %v3168_v26 = vpop.eup %3167  ;;  %3193 = vpow2.f32 %v4226_v16  ;;  %5380 = vst [vmem:[#allocation17_spill] sm:$0xff] %v4320_v40  ;;  %v1189_v16 = vadd.f32 1.0, %v3166_v2  ;;  %v4337_v28 = vadd.f32 %v4250_v54, %v4121_v25  ;;  %v4340_v30 = vadd.f32 %v854_v55, %v4177_v33 }
 0x165   : > { %v4312_v14 = vpop.eup %3169  ;;  %3195 = vrcp.f32 %v1230_v36  ;;  %5381 = vst [vmem:[#allocation18_spill] sm:$0xff] %v4326_v47  ;;  %5382 = vst [vmem:[#allocation19_spill] sm:$0xff] %v4330_v11  ;;  %v1199_v18 = vadd.f32 1.0, %v3168_v26  ;;  %v4344_v15 = vmul.f32 -1.442695, %v4310_v32  ;;  %v4347_v6 = vadd.f32 %v805_v62, %v4106_v19 }
 0x166   : > { %v4322_v43 = vpop.eup %3171  ;;  %3197 = vrcp.f32 %v1188_v52  ;;  %5383 = vst [vmem:[#allocation20_spill] sm:$0xff] %v4337_v28  ;;  %5384 = vst [vmem:[#allocation23_spill] sm:$0xff] %v4340_v30  ;;  %v4350_v13 = vadd.f32 %v2830_v3, %v4177_v33  ;;  %v2620_v54 = vmul.f32 -1.442695, %v4316_v31  ;;  %v4356_v55 = vmul.f32 -1.442695, %v4320_v40 }
 0x167   : > { %v4332_v42 = vpop.eup %3173  ;;  %3199 = vpow2.f32 %v4237_v41  ;;  %5385 = vst [vmem:[#allocation24_spill] sm:$0xff] %v4347_v6  ;;  %v2833_v41 = vpop.f32.mrf.mxu1  ;;  %v4362_v62 = vmul.f32 -1.442695, %v4326_v47  ;;  %v4365_v3 = vadd.f32 %v857_v63, %v4177_v33  ;;  %v4368_v27 = vadd.f32 %v811_v58, %v4106_v19 }
 0x168   : > { %v3176_v12 = vpop.eup %3175  ;;  %3201 = vpow2.f32 %v4242_v8  ;;  %5386 = vst [vmem:[#allocation25_spill] sm:$0xff] %v4350_v13  ;;  %v4359_v8 = vadd.f32 %v807_v23, %v4121_v25  ;;  %v4373_v2 = vmul.f32 -1.442695, %v4330_v11  ;;  %v4376_v23 = vmul.f32 -1.442695, %v4337_v28  ;;  %v5391_v28 = vld [vmem:[#allocation27_spill] sm:$0xff] }
 0x169   : > { %v4352_v59 = vpop.eup %3177  ;;  %3203 = vrcp.f32 %v1231_v60  ;;  %5388 = vst [vmem:[#allocation21_spill] sm:$0xff] %v4365_v3  ;;  %5389 = vst [vmem:[#allocation52_spill] sm:$0xff] %v4368_v27  ;;  %v4379_v26 = vmul.f32 -1.442695, %v4340_v30  ;;  %v4383_v63 = vmul.f32 -1.442695, %v4347_v6  ;;  %v4389_v58 = vadd.f32 %v2833_v41, %v4177_v33 }
 0x16a   : > { %5387 = vst [vmem:[#allocation26_spill] sm:$0xff] %v4359_v8  ;;  %v3180_v36 = vpop.eup %3179  ;;  %3205 = vrcp.f32 %v1189_v16  ;;  %v4386_v16 = vmul.f32 -1.442695, %v4350_v13  ;;  %v1481_v47 = vmul.f32 %v4136_v24, %v5391_v28  ;;  %v4397_v30 = vmul.f32 -1.442695, %v4359_v8 }
 0x16b   : > { %v4370_v52 = vpop.eup %3181  ;;  %3207 = vrcp.f32 %v1199_v18  ;;  %5390 = vst [vmem:[#allocation53_spill] sm:$0xff] %v4389_v58  ;;  %v870_v18 = vpop.f32.mrf.mxu1  ;;  %v1439_v41 = vmul.f32 %v4144_v4, %v3917_v37  ;;  %v4408_v13 = vmul.f32 -1.442695, %v4365_v3  ;;  %v4411_v24 = vmul.f32 -1.442695, %v4368_v27 }
 0x16c   : > { %v3184_v60 = vpop.eup %3183  ;;  %3209 = vpow2.f32 %v4248_v34  ;;  %v4400_v34 = vadd.f32 %v813_v50, %v4121_v25  ;;  %v1492_v28 = vmul.f32 %v4179_v44, %v3948_v56  ;;  %v1157_v50 = vadd.f32 1.0, %v3176_v12  ;;  %v815_v3 = vpop.f32.mrf.mxu0 }
 0x16d   : > { %v4391_v11 = vpop.eup %3185  ;;  %3211 = vpow2.f32 %v4245_v57  ;;  %v4419_v8 = vadd.f32 %v870_v18, %v4177_v33  ;;  %v1482_v4 = vmul.f32 %v4160_v10, %v3923_v35  ;;  %v4427_v27 = vmul.f32 -1.442695, %v4389_v58  ;;  %v5396_v58 = vld [vmem:[#allocation32_spill] sm:$0xff] }
 0x16e   : > { %v4402_v6 = vpop.eup %3187  ;;  %3213 = vpow2.f32 %v4291_v21  ;;  %v1200_v21 = vadd.f32 1.0, %v3180_v36  ;;  %v1534_v56 = vadd.f32 %v4296_v38, %v1481_v47  ;;  %v1440_v44 = vmul.f32 %v4170_v22, %v3936_v1  ;;  %v2834_v36 = vpop.f32.mrf.mxu1 }
 0x16f   : > { %v4413_v57 = vpop.eup %3189  ;;  %3215 = vpow2.f32 %v4255_v61  ;;  %v4434_v61 = vmul.f32 -1.442695, %v4400_v34  ;;  %v1556_v35 = vadd.f32 %v4298_v46, %v1439_v41  ;;  %v1493_v10 = vmul.f32 %v4213_v39, %v3969_v51  ;;  %v5392_v46 = vld [vmem:[#allocation51_spill] sm:$0xff] }
 0x170   : > { %v4421_v37 = vpop.eup %3191  ;;  %3217 = vpow2.f32 %v4301_v0  ;;  %v1158_v0 = vadd.f32 1.0, %v3184_v60  ;;  %v1535_v38 = vadd.f32 %v1534_v56, %v1492_v28  ;;  %v4444_v1 = vmul.f32 -1.442695, %v4419_v8  ;;  %v5393_v60 = vld [vmem:[#allocation29_spill] sm:$0xff]  ;;  %v5394_v28 = vld [vmem:[#allocation48_spill] sm:$0xff] }
 0x171   : > { %v3194_v40 = vpop.eup %3193  ;;  %3219 = vpow2.f32 %v4294_v9  ;;  %v4447_v22 = vadd.f32 %v815_v3, %v4106_v19  ;;  %v1547_v47 = vadd.f32 %v4303_v53, %v1482_v4  ;;  %v1451_v41 = vmul.f32 %v5392_v46, %v3977_v7  ;;  %v817_v4 = vpop.f32.mrf.mxu0  ;;  %v5397_v46 = vld [vmem:[#allocation30_spill] sm:$0xff] }
 0x172   : > { %v4436_v12 = vpop.eup %3195  ;;  %3221 = vpow2.f32 %v2620_v54  ;;  %v1210_v51 = vadd.f32 1.0, %v3194_v40  ;;  %v1569_v54 = vadd.f32 %v4305_v45, %v1440_v44  ;;  %v4457_v56 = vadd.f32 %v2834_v36, %v4177_v33 }
 0x173   : > { %v4441_v18 = vpop.eup %3197  ;;  %3223 = vrcp.f32 %v1157_v50  ;;  %v1450_v50 = vmul.f32 %v5394_v28, %v5393_v60  ;;  %v1548_v3 = vadd.f32 %v1547_v47, %v1493_v10  ;;  %v1462_v53 = vmul.f32 %v4286_v49, %v5396_v58  ;;  %v5398_v47 = vld [vmem:[#allocation36_spill] sm:$0xff] }
 0x174   : > { %v3200_v9 = vpop.eup %3199  ;;  %3225 = vrcp.f32 %v1200_v21  ;;  %5395 = vst [vmem:[#allocation27_spill] sm:$0xff] %v4457_v56  ;;  %v1536_v21 = vrot.slane %v1535_v38, 4  ;;  %v4465_v44 = vmul.f32 -1.442695, %v4447_v22  ;;  %v1570_v36 = vadd.f32 %v1569_v54, %v1451_v41 }
 0x175   : > { %v3202_v39 = vpop.eup %3201  ;;  %3227 = vpow2.f32 %v4344_v15  ;;  %v1168_v45 = vadd.f32 1.0, %v3200_v9  ;;  %v1461_v10 = vmul.f32 %v4259_v5, %v5397_v46  ;;  %v1473_v49 = vmul.f32 %v4352_v59, %v5398_v47  ;;  %v5399_v59 = vld [vmem:[#allocation34_spill] sm:$0xff] }
 0x176   : > { %v3204_v19 = vpop.eup %3203  ;;  %3229 = vrcp.f32 %v1158_v0  ;;  %v1211_v7 = vadd.f32 1.0, %v3202_v39  ;;  %v1557_v0 = vadd.f32 %v1556_v35, %v1450_v50  ;;  %v4475_v9 = vmul.f32 -1.442695, %v4457_v56  ;;  %v5400_v35 = vld [vmem:[#allocation42_spill] sm:$0xff]  ;;  %v5401_v56 = vld [vmem:[#allocation40_spill] sm:$0xff] }
 0x177   : > { %v4461_v40 = vpop.eup %3205  ;;  %3231 = vpow2.f32 %v4356_v55  ;;  %v4478_v55 = vadd.f32 %v817_v4, %v4121_v25  ;;  %v1549_v60 = vrot.slane %v1548_v3, 4  ;;  %v1571_v41 = vadd.f32 %v1570_v36, %v1462_v53 }
 0x178   : > { %v4467_v15 = vpop.eup %3207  ;;  %3233 = vrcp.f32 %v1210_v51  ;;  %v4480_v28 = vadd.f32 %v1536_v21, %v1535_v38  ;;  %v1472_v51 = vmul.f32 %v4322_v43, %v5399_v59  ;;  %v1558_v46 = vadd.f32 %v1557_v0, %v1461_v10 }
 0x179   : > { %v3210_v58 = vpop.eup %3209  ;;  %3235 = vpow2.f32 %v4362_v62  ;;  %v1484_v62 = vmul.f32 %v4413_v57, %v5400_v35  ;;  %v1572_v47 = vadd.f32 %v1571_v41, %v1473_v49  ;;  %v1483_v53 = vmul.f32 %v4391_v11, %v5401_v56  ;;  %v5404_v41 = vld [vmem:[#allocation44_spill] sm:$0xff]  ;;  %v5405_v56 = vld [vmem:[#allocation35_spill] sm:$0xff]  ;;  %v5407_v35 = vld [vmem:[#allocation33_spill] sm:$0xff] }
 0x17a   : > { %v3212_v39 = vpop.eup %3211  ;;  %3237 = vrcp.f32 %v1211_v7  ;;  %v1221_v54 = vadd.f32 1.0, %v3210_v58  ;;  %v5402_v7 = vld [vmem:[#allocation10_spill] sm:$0xff]  ;;  %v4490_v43 = vadd.f32 %v1549_v60, %v1548_v3  ;;  %v5403_v58 = vld [vmem:[#allocation31_spill] sm:$0xff]  ;;  %v1559_v49 = vadd.f32 %v1558_v46, %v1472_v51 }
 0x17b   : > { %v3214_v5 = vpop.eup %3213  ;;  %3239 = vrcp.f32 %v1168_v45  ;;  %v1495_v36 = vmul.f32 %v3204_v19, %v5402_v7  ;;  %v1169_v38 = vadd.f32 1.0, %v3212_v39  ;;  %v1419_v57 = vmul.f32 %v4280_v29, %v5403_v58  ;;  %v5406_v19 = vld [vmem:[#allocation39_spill] sm:$0xff] }
 0x17c   : > { %v3216_v50 = vpop.eup %3215  ;;  %3241 = vrcp.f32 %v1221_v54  ;;  %v1222_v25 = vadd.f32 1.0, %v3214_v5  ;;  %v1573_v0 = vadd.f32 %v1572_v47, %v1484_v62  ;;  %v1494_v54 = vmul.f32 %v4436_v12, %v5404_v41  ;;  %v5409_v47 = vld [vmem:[#allocation43_spill] sm:$0xff] }
 0x17d   : > { %v3218_v4 = vpop.eup %3217  ;;  %3243 = vpow2.f32 %v4373_v2  ;;  %v1430_v2 = vmul.f32 %v4332_v42, %v5405_v56  ;;  %v1431_v3 = vmul.f32 %v4370_v52, %v5406_v19  ;;  %v1560_v60 = vadd.f32 %v1559_v49, %v1483_v53 }
 0x17e   : > { %v3220_v21 = vpop.eup %3219  ;;  %3245 = vrcp.f32 %v1222_v25  ;;  %v1232_v45 = vadd.f32 1.0, %v3218_v4  ;;  %v1574_v5 = vadd.f32 %v1573_v0, %v1495_v36  ;;  %v1179_v59 = vadd.f32 1.0, %v3216_v50  ;;  %v5410_v36 = vld [vmem:[#allocation45_spill] sm:$0xff]  ;;  %v873_v0 = vpop.f32.mrf.mxu1 }
 0x17f   : > { %v3222_v10 = vpop.eup %3221  ;;  %3247 = vpow2.f32 %v4376_v23  ;;  %v1420_v12 = vmul.f32 %v4312_v14, %v5407_v35  ;;  %v5408_v23 = vld [vmem:[#allocation41_spill] sm:$0xff]  ;;  %v1180_v46 = vadd.f32 1.0, %v3220_v21  ;;  %v1538_v52 = vrot.slane %v4480_v28, 2  ;;  %v5411_v21 = vld [vmem:[#allocation22_spill] sm:$0xff] }
 0x180   : > { %v4497_v11 = vpop.eup %3223  ;;  %3249 = vrcp.f32 %v1232_v45  ;;  %v1233_v29 = vadd.f32 1.0, %v3222_v10  ;;  %v1441_v62 = vmul.f32 %v4402_v6, %v5408_v23  ;;  %v1442_v25 = vmul.f32 %v4421_v37, %v5409_v47  ;;  %v5415_v23 = vld [vmem:[#allocation50_spill] sm:$0xff] }
 0x181   : > { %v3226_v39 = vpop.eup %3225  ;;  %3251 = vrcp.f32 %v1169_v38  ;;  %v1561_v4 = vadd.f32 %v1560_v60, %v1494_v54  ;;  %v1581_v53 = vadd.f32 %v1430_v2, %v1419_v57  ;;  %v1594_v7 = vadd.f32 %v1431_v3, %v1420_v12  ;;  %v5413_v2 = vld [vmem:[#allocation12_spill] sm:$0xff]  ;;  %v5414_v3 = vld [vmem:[#allocation47_spill] sm:$0xff] }
 0x182   : > { %v3228_v51 = vpop.eup %3227  ;;  %3253 = vrcp.f32 %v1233_v29  ;;  %v1452_v14 = vmul.f32 %v4441_v18, %v5410_v36  ;;  %v1575_v38 = vrot.slane %v1574_v5, 4  ;;  %v1453_v58 = vmul.f32 %v4461_v40, %v5411_v21 }
 0x183   : > { %v4507_v42 = vpop.eup %3229  ;;  %3255 = vpow2.f32 %v4379_v26  ;;  %v1190_v45 = vadd.f32 1.0, %v3228_v51  ;;  %v1551_v37 = vrot.slane %v4490_v43, 2  ;;  %v1582_v49 = vadd.f32 %v1581_v53, %v1441_v62  ;;  %v5412_v26 = vld [vmem:[#allocation11_spill] sm:$0xff] }
 0x184   : > { %v3232_v50 = vpop.eup %3231  ;;  %3257 = vpow2.f32 %v4383_v63  ;;  %v1463_v57 = vmul.f32 %v4467_v15, %v5412_v26  ;;  %v1595_v18 = vadd.f32 %v1594_v7, %v1442_v25  ;;  %v1562_v54 = vrot.slane %v1561_v4, 4  ;;  %v5416_v62 = vld [vmem:[#allocation15_spill] sm:$0xff] }
 0x185   : > { %v3234_v6 = vpop.eup %3233  ;;  %3259 = vrcp.f32 %v1179_v59  ;;  %v1191_v63 = vadd.f32 1.0, %v3232_v50  ;;  %v1583_v40 = vadd.f32 %v1582_v49, %v1452_v14  ;;  %v1464_v19 = vmul.f32 %v3226_v39, %v5413_v2 }
 0x186   : > { %v3236_v10 = vpop.eup %3235  ;;  %3261 = vrcp.f32 %v1180_v46  ;;  %v1474_v29 = vmul.f32 %v3234_v6, %v5414_v3  ;;  %v1576_v59 = vadd.f32 %v1575_v38, %v1574_v5  ;;  %v1596_v15 = vadd.f32 %v1595_v18, %v1453_v58 }
 0x187   : > { %v3238_v41 = vpop.eup %3237  ;;  %3263 = vpow2.f32 %v4386_v16  ;;  %v4528_v51 = vadd.f32 %v873_v0, %v4177_v33  ;;  %v1584_v12 = vadd.f32 %v1583_v40, %v1463_v57  ;;  %v1552_v47 = vadd.f32 %v1551_v37, %v4490_v43 }
 0x188   : > { %v4522_v56 = vpop.eup %3239  ;;  %3265 = vpow2.f32 %v4397_v30  ;;  %v1475_v16 = vmul.f32 %v3238_v41, %v5415_v23  ;;  %v1563_v25 = vadd.f32 %v1562_v54, %v1561_v4  ;;  %v2622_v30 = vmul.f32 -1.442695, %v4478_v55 }
 0x189   : > { %v3242_v60 = vpop.eup %3241  ;;  %3267 = vrcp.f32 %v1190_v45  ;;  %v1597_v50 = vadd.f32 %v1596_v15, %v1464_v19  ;;  %v1585_v53 = vadd.f32 %v1584_v12, %v1474_v29  ;;  %v1539_v36 = vadd.f32 %v1538_v52, %v4480_v28 }
 0x18a   : > { %v3244_v35 = vpop.eup %3243  ;;  %v1485_v46 = vmul.f32 %v3242_v60, %v5416_v62  ;;  %3269 = vpow2.f32 %v4408_v13  ;;  %v1577_v14 = vrot.slane %v1576_v59, 2  ;;  %v2601_v13 = vmul.f32 -1.442695, %v4528_v51 }
 0x18b   : > { %v3246_v39 = vpop.eup %3245  ;;  %3271 = vrcp.f32 %v1191_v63  ;;  %v1598_v4 = vadd.f32 %v1597_v50, %v1475_v16  ;;  %v1564_v58 = vrot.slane %v1563_v25, 2  ;;  %v1540_v49 = vrot.slane %v1539_v36, 1 }
 0x18c   : > { %v3248_v5 = vpop.eup %3247  ;;  %v1486_v33 = vmul.f32 %v3246_v39, %v4265_v20  ;;  %3273 = vpow2.f32 %v4411_v24  ;;  %v1586_v6 = vadd.f32 %v1585_v53, %v1485_v46  ;;  %v1553_v20 = vrot.slane %v1552_v47, 1 }
 0x18d   : > { %v3250_v7 = vpop.eup %3249  ;;  %3275 = vpow2.f32 %v4427_v27  ;;  %v1201_v24 = vadd.f32 1.0, %v3236_v10  ;;  %v1578_v26 = vadd.f32 %v1577_v14, %v1576_v59  ;;  %v1181_v57 = vadd.f32 1.0, %v3244_v35 }
 0x18e   : > { %v4540_v43 = vpop.eup %3251  ;;  %v1496_v38 = vmul.f32 %v3250_v7, %v4278_v48  ;;  %3277 = vpow2.f32 %v4434_v61  ;;  %v1599_v52 = vadd.f32 %v1598_v4, %v1486_v33  ;;  %v1202_v10 = vadd.f32 1.0, %v3248_v5  ;;  %v5418_v5 = vld [vmem:[#allocation6_spill] sm:$0xff] }
 0x18f   : > { %v3254_v21 = vpop.eup %3253  ;;  %3279 = vpow2.f32 %v4444_v1  ;;  %v1554_v41 = vadd.f32 %v1553_v20, %v1552_v47  ;;  %v1565_v18 = vadd.f32 %v1564_v58, %v1563_v25  ;;  %v1541_v19 = vadd.f32 %v1540_v49, %v1539_v36 }
 0x190   : > { %v3256_v28 = vpop.eup %3255  ;;  %v1587_v45 = vadd.f32 %v1586_v6, %v1496_v38  ;;  %v1497_v27 = vmul.f32 %v3254_v21, %v4316_v31  ;;  %3281 = vpow2.f32 %v4465_v44  ;;  %v1579_v29 = vrot.slane %v1578_v26, 1 }
 0x191   : > { %v3258_v37 = vpop.eup %3257  ;;  %3283 = vpow2.f32 %v4475_v9  ;;  %v1159_v54 = vadd.f32 1.0, %v3256_v28  ;;  %v5417_v9 = vld [vmem:[#allocation46_spill] sm:$0xff]  ;;  %v1658_v23 = vcombine.low %v1541_v19, %v1554_v41  ;;  %v1566_v16 = vrot.slane %v1565_v18, 1 }
 0x192   : > { %v4548_v48 = vpop.eup %3259  ;;  %v1588_v61 = vrot.slane %v1587_v45, 4  ;;  %v1600_v0 = vadd.f32 %v1599_v52, %v1497_v27  ;;  %3285 = vpow2.f32 %v2622_v30  ;;  %v1212_v40 = vadd.f32 1.0, %v3258_v37  ;;  %v5420_v28 = vld [vmem:[#allocation38_spill] sm:$0xff] }
 0x193   : > { %v4550_v1 = vpop.eup %3261  ;;  %3287 = vpow2.f32 %v2601_v13  ;;  %v1663_v3 = vunpack.c.0.s8 %v5417_v9  ;;  %v1580_v53 = vadd.f32 %v1579_v29, %v1578_v26  ;;  %v1567_v6 = vadd.f32 %v1566_v16, %v1565_v18  ;;  %v5422_v18 = vld [vmem:[#allocation28_spill] sm:$0xff] }
 0x194   : > { %v3264_v31 = vpop.eup %3263  ;;  %v1589_v44 = vadd.f32 %v1588_v61, %v1587_v45  ;;  %v1601_v63 = vrot.slane %v1600_v0, 4  ;;  %3289 = vrcp.f32 %v1201_v24  ;;  %v5419_v24 = vld [vmem:[#allocation37_spill] sm:$0xff]  ;;  %v5425_v29 = vld [vmem:[#allocation16_spill] sm:$0xff] }
 0x195   : > { %v3266_v2 = vpop.eup %3265  ;;  %3291 = vrcp.f32 %v1181_v57  ;;  %v1192_v62 = vadd.f32 1.0, %v3264_v31  ;;  %v4556_v50 = vsub.s32 %v1663_v3, %v5418_v5  ;;  %v5421_v52 = vcombine.low %v5419_v24, %v5420_v28  ;;  %v5423_v31 = vld [vmem:[#allocation49_spill] sm:$0xff]  ;;  %v5431_v28 = vld [vmem:[#allocation24_spill] sm:$0xff] }
 0x196   : > { %v4553_v60 = vpop.eup %3267  ;;  %v1590_v59 = vrot.slane %v1589_v44, 2  ;;  %v1602_v15 = vadd.f32 %v1601_v63, %v1600_v0  ;;  %3293 = vrcp.f32 %v1202_v10  ;;  %v1213_v35 = vadd.f32 1.0, %v3266_v2 }
 0x197   : > { %v3270_v12 = vpop.eup %3269  ;;  %3295 = vrcp.f32 %v1159_v54  ;;  %v1674_v4 = vrot.slane %v1658_v23, %v4556_v50  ;;  %v1667_v45 = vrot.slane %v5421_v52, %v4556_v50  ;;  %v1659_v27 = vcombine.low %v1567_v6, %v1580_v53  ;;  %v5426_v23 = vld [vmem:[#allocation13_spill] sm:$0xff] }
 0x198   : > { %v3272_v46 = vpop.eup %3271  ;;  %v1591_v39 = vadd.f32 %v1590_v59, %v1589_v44  ;;  %v1603_v47 = vrot.slane %v1602_v15, 2  ;;  %3297 = vrcp.f32 %v1212_v40  ;;  %v1170_v25 = vadd.f32 1.0, %v3270_v12  ;;  %v5424_v40 = vld [vmem:[#allocation14_spill] sm:$0xff]  ;;  %v5432_v52 = vld [vmem:[#allocation21_spill] sm:$0xff] }
 0x199   : > { %v3274_v30 = vpop.eup %3273  ;;  %3299 = vrcp.f32 %v1213_v35  ;;  %v1689_v41 = vcombine.low %v1667_v45, %v1674_v4  ;;  %v1421_v54 = vmul.f32 %v4497_v11, %v5422_v18  ;;  %v1432_v44 = vmul.f32 %v4522_v56, %v5423_v31  ;;  %v5435_v18 = vld [vmem:[#allocation52_spill] sm:$0xff] }
 0x19a   : > { %v3276_v33 = vpop.eup %3275  ;;  %v1592_v7 = vrot.slane %v1591_v39, 1  ;;  %v1604_v36 = vadd.f32 %v1603_v47, %v1602_v15  ;;  %3301 = vrcp.f32 %v1170_v25  ;;  %v1223_v14 = vadd.f32 1.0, %v3274_v30 }
 0x19b   : > { %v3278_v13 = vpop.eup %3277  ;;  %3303 = vrcp.f32 %v1192_v62  ;;  %v1225_v37 = vadd.f32 1.0, %v3276_v33  ;;  %v1433_v2 = vmul.f32 %v4540_v43, %v5424_v40  ;;  %v1443_v59 = vmul.f32 %v4548_v48, %v5425_v29  ;;  %v5427_v33 = vld [vmem:[#allocation17_spill] sm:$0xff] }
 0x19c   : > { %v3280_v38 = vpop.eup %3279  ;;  %v1605_v21 = vrot.slane %v1604_v36, 1  ;;  %3305 = vrcp.f32 %v1223_v14  ;;  %v1224_v20 = vadd.f32 1.0, %v3278_v13  ;;  %v1593_v57 = vadd.f32 %v1592_v7, %v1591_v39 }
 0x19d   : > { %v3282_v58 = vpop.eup %3281  ;;  %v1203_v49 = vadd.f32 1.0, %v3280_v38  ;;  %v1681_v11 = vrot.slane %v1659_v27, %v4556_v50  ;;  %v1422_v56 = vmul.f32 %v4507_v42, %v5426_v23  ;;  %v1607_v62 = vadd.f32 %v1432_v44, %v1421_v54  ;;  %v5428_v42 = vld [vmem:[#allocation18_spill] sm:$0xff] }
 0x19e   : > { %v3284_v26 = vpop.eup %3283  ;;  %v1606_v61 = vadd.f32 %v1605_v21, %v1604_v36  ;;  %3307 = vrcp.f32 %v1224_v20  ;;  %v1234_v0 = vadd.f32 1.0, %v3282_v58  ;;  %v1444_v39 = vmul.f32 %v4550_v1, %v4271_v17  ;;  %v5430_v58 = vld [vmem:[#allocation23_spill] sm:$0xff] }
 0x19f   : > { %v3286_v10 = vpop.eup %3285  ;;  %3309 = vrcp.f32 %v1203_v49  ;;  %v1236_v15 = vadd.f32 1.0, %v3284_v26  ;;  %v1454_v48 = vmul.f32 %v4553_v60, %v4310_v32  ;;  %v1620_v25 = vadd.f32 %v1433_v2, %v1422_v56  ;;  %v1501_v32 = vld [vmem:[#allocation2] sm:$0xff]  ;;  %v5433_v26 = vld [vmem:[#allocation26_spill] sm:$0xff] }
 0x1a0   : > { %v3288_v63 = vpop.eup %3287  ;;  %v1660_v19 = vcombine.low %v1593_v57, %v1606_v61  ;;  %3311 = vrcp.f32 %v1234_v0  ;;  %v1235_v9 = vadd.f32 1.0, %v3286_v10  ;;  %v1608_v53 = vadd.f32 %v1607_v62, %v1443_v59  ;;  %v5429_v60 = vld [vmem:[#allocation20_spill] sm:$0xff]  ;;  %v5434_v0 = vld [vmem:[#allocation19_spill] sm:$0xff]  ;;  %v5436_v2 = vld [vmem:[#allocation25_spill] sm:$0xff] }
 0x1a1   : > { %v3290_v3 = vpop.eup %3289  ;;  %3313 = vrcp.f32 %v1225_v37  ;;  %v1214_v35 = vadd.f32 1.0, %v3288_v63  ;;  %v1455_v7 = vmul.f32 %v3272_v46, %v5427_v33  ;;  %v1697_v13 = vrot.slane %v1689_v41, %v4556_v50 }
 0x1a2   : > { %v3292_v12 = vpop.eup %3291  ;;  %v1688_v16 = vrot.slane %v1660_v19, %v4556_v50  ;;  %3315 = vrcp.f32 %v1235_v9  ;;  %v1465_v36 = vmul.f32 %v3290_v3, %v5428_v42  ;;  %v1621_v1 = vadd.f32 %v1620_v25, %v1444_v39  ;;  %v5438_v42 = vld [vmem:[#allocation27_spill] sm:$0xff] }
 0x1a3   : > { %v3294_v43 = vpop.eup %3293  ;;  %3317 = vrcp.f32 %v1214_v35  ;;  %v1609_v6 = vadd.f32 %v1608_v53, %v1454_v48  ;;  %v1445_v10 = vmul.f32 %v3292_v12, %v5434_v0 }
 0x1a4   : > { %v3296_v47 = vpop.eup %3295  ;;  %v1690_v30 = vcombine.low %v1681_v11, %v1688_v16  ;;  %3319 = vrcp.f32 %v1236_v15  ;;  %v1466_v38 = vmul.f32 %v3294_v43, %v5429_v60  ;;  %v1622_v37 = vadd.f32 %v1621_v1, %v1455_v7 }
 0x1a5   : > { %v3298_v5 = vpop.eup %3297  ;;  %v1423_v24 = vmul.f32 %v3296_v47, %v5430_v58  ;;  %v1610_v49 = vadd.f32 %v1609_v6, %v1465_v36 }
 0x1a6   : > { %v3300_v14 = vpop.eup %3299  ;;  %v1704_v4 = vrot.slane %v1690_v30, %v4556_v50  ;;  %v1476_v46 = vmul.f32 %v3298_v5, %v5431_v28  ;;  %v1623_v44 = vadd.f32 %v1622_v37, %v1466_v38  ;;  %v5437_v5 = vld [vmem:[#allocation53_spill] sm:$0xff] }
 0x1a7   : > { %v3302_v17 = vpop.eup %3301  ;;  %v1477_v57 = vmul.f32 %v3300_v14, %v5433_v26  ;;  %v1502_v37 = vld [vmem:[#allocation2 + $0x8] sm:$0x7]  ;;  %v5439_v26 = vlaneseq }
 0x1a8   : > { %v3304_v21 = vpop.eup %3303  ;;  %v1705_v20 = vcombine.low %v1697_v13, %v1704_v4  ;;  %v1434_v45 = vmul.f32 %v3302_v17, %v5432_v52  ;;  %v1611_v40 = vadd.f32 %v1610_v49, %v1476_v46 }
 0x1a9   : > { %v3306_v27 = vpop.eup %3305  ;;  %v1456_v19 = vmul.f32 %v3304_v21, %v5436_v2  ;;  %v1624_v59 = vadd.f32 %v1623_v44, %v1477_v57  ;;  %vm1736_vm4 = vcmp.lt.s32.totalorder %v5439_v26, 384 }
 0x1aa   : > { %v1731_v61 = vadd.f32 %v1705_v20, %v1501_v32  ;;  %v1633_v41 = vadd.f32 %v1434_v45, %v1423_v24  ;;  %v1487_v54 = vmul.f32 %v3306_v27, %v5435_v18 }
 0x1ab   : > { %v3308_v31 = vpop.eup %3307 }
 0x1ac   : > { %v3310_v63 = vpop.eup %3309  ;;  %1733 = vst [vmem:[#allocation2] sm:$0xff] %v1731_v61  ;;  %v1634_v9 = vadd.f32 %v1633_v41, %v1445_v10  ;;  %v1488_v3 = vmul.f32 %v3308_v31, %v4400_v34  ;;  %v1612_v35 = vadd.f32 %v1611_v40, %v1487_v54 }
 0x1ad   : > { %v3312_v29 = vpop.eup %3311  ;;  %v1467_v11 = vmul.f32 %v3310_v63, %v4419_v8 }
 0x1ae   : > { %v3314_v15 = vpop.eup %3313  ;;  %v1635_v12 = vadd.f32 %v1634_v9, %v1456_v19  ;;  %v1498_v23 = vmul.f32 %v3312_v29, %v4447_v22  ;;  %v1625_v43 = vadd.f32 %v1624_v59, %v1488_v3 }
 0x1af   : > { %v3316_v56 = vpop.eup %3315  ;;  %v1489_v53 = vmul.f32 %v3314_v15, %v5437_v5 }
 0x1b0   : > { %v3318_v16 = vpop.eup %3317  ;;  %v1636_v62 = vadd.f32 %v1635_v12, %v1467_v11  ;;  %v1613_v39 = vadd.f32 %v1612_v35, %v1498_v23  ;;  %v1499_v48 = vmul.f32 %v3316_v56, %v4478_v55 }
 0x1b1   : > { %v1478_v47 = vmul.f32 %v3318_v16, %v4528_v51  ;;  %v3320_v25 = vpop.eup %3319 }
 0x1b2   : > { %v1614_v34 = vrot.slane %v1613_v39, 4  ;;  %v1626_v30 = vadd.f32 %v1625_v43, %v1499_v48  ;;  %v1500_v36 = vmul.f32 %v3320_v25, %v5438_v42 }
 0x1b3   : > { %v1637_v33 = vadd.f32 %v1636_v62, %v1478_v47 }
 0x1b4   : > { %v1615_v7 = vadd.f32 %v1614_v34, %v1613_v39  ;;  %v1627_v8 = vrot.slane %v1626_v30, 4 }
 0x1b5   : > { %v1638_v22 = vadd.f32 %v1637_v33, %v1489_v53 }
 0x1b6   : > { %v1616_v14 = vrot.slane %v1615_v7, 2  ;;  %v1628_v13 = vadd.f32 %v1627_v8, %v1626_v30 }
 0x1b7   : > { %v1639_v4 = vadd.f32 %v1638_v22, %v1500_v36 }
 0x1b8   : > { %v1617_v17 = vadd.f32 %v1616_v14, %v1615_v7  ;;  %v1629_v1 = vrot.slane %v1628_v13, 2 }
 0x1b9   : > { %v1640_v6 = vrot.slane %v1639_v4, 4 }
 0x1ba   : > { %v1630_v55 = vadd.f32 %v1629_v1, %v1628_v13  ;;  %v1618_v32 = vrot.slane %v1617_v17, 1 }
 0x1bb   : > { %v1641_v51 = vadd.f32 %v1640_v6, %v1639_v4 }
 0x1bc   : > { %v1631_v60 = vrot.slane %v1630_v55, 1  ;;  %v1619_v20 = vadd.f32 %v1618_v32, %v1617_v17 }
 0x1bd   : > { %v1642_v38 = vrot.slane %v1641_v51, 2 }
 0x1be   : > { %v1632_v21 = vadd.f32 %v1631_v60, %v1630_v55 }
 0x1bf   : > { %v1643_v58 = vadd.f32 %v1642_v38, %v1641_v51 }
 0x1c0   : > { %v1706_v24 = vcombine.low %v1619_v20, %v1632_v21 }
 0x1c1   : > { %v1644_v28 = vrot.slane %v1643_v58, 1 }
 0x1c2   : > { %v1713_v52 = vrot.slane %v1706_v24, %v4556_v50 }
 0x1c3   : > { %v1645_v46 = vadd.f32 %v1644_v28, %v1643_v58 }
 0x1c5   : > { %v1720_v45 = vrot.slane %v1645_v46, %v4556_v50 }
 0x1c7   : > { %v1721_v27 = vcombine.low %v1713_v52, %v1720_v45 }
 0x1c9   : > { %v1728_v49 = vrot.slane %v1721_v27, %v4556_v50  ;;  %1742 = sbr.rel (%p2624_p1) target bundleno = 765 (0x2fd), region = 48 }
 0x1cb   : > { %v1732_v57 = vadd.f32 %v1728_v49, %v1502_v37 }
 0x1cd   : > { %1738 = vst.msk [vmem:[#allocation2 + $0x8] sm:$0x7] %vm1736_vm4, %v1732_v57 }
 0x1ce   : > { %v1778_v61 = vld [vmem:[%s5228_s3 + $0xf8] sm:$0xff]  ;;  %v1777_v10 = vld [vmem:[%s5228_s3 + $0xf0] sm:$0xff]  ;;  %v1776_v54 = vld [vmem:[%s5228_s3 + $0xe8] sm:$0xff]  ;;  %vm3420_vm5 = vmmov 0   ;;  %vm2401_vm6 = vcmask 16384  }
 0x1cf   : > { %v1762_v0 = vld [vmem:[%s5228_s3 + $0x78] sm:$0xff]  ;;  %2633 = vmatprep.subr.mxu0 %v1778_v61  ;;  %v1761_v41 = vld [vmem:[%s5228_s3 + $0x70] sm:$0xff]  ;;  %v1760_v44 = vld [vmem:[%s5228_s3 + $0x68] sm:$0xff] }
 0x1d0   : > { %v1810_v50 = vld [vmem:[%s5228_s3 + $0x1f8] sm:$0xff]  ;;  %2634 = vmatpush3.msra.mxu0 %v1762_v0  ;;  %v1809_v31 = vld [vmem:[%s5228_s3 + $0x1f0] sm:$0xff]  ;;  %v1808_v40 = vld [vmem:[%s5228_s3 + $0x1e8] sm:$0xff] }
 0x1d1   : > { %v1794_v18 = vld [vmem:[%s5228_s3 + $0x178] sm:$0xff]  ;;  %2668 = vmatprep.subr.mxu1 %v1810_v50  ;;  %2635 = vmatprep.subr.mxu0 %v1777_v10  ;;  %v1793_v63 = vld [vmem:[%s5228_s3 + $0x170] sm:$0xff]  ;;  %v1775_v2 = vld [vmem:[%s5228_s3 + $0xe0] sm:$0xff] }
 0x1d2   : > { %2669 = vmatpush3.msra.mxu1 %v1794_v18  ;;  %2636 = vmatpush3.msra.mxu0 %v1761_v41  ;;  %v1792_v19 = vld [vmem:[%s5228_s3 + $0x168] sm:$0xff]  ;;  %v1759_v9 = vld [vmem:[%s5228_s3 + $0x60] sm:$0xff]  ;;  %v1774_v29 = vld [vmem:[%s5228_s3 + $0xd8] sm:$0xff] }
 0x1d3   : > { %2670 = vmatprep.subr.mxu1 %v1809_v31  ;;  %2637 = vmatprep.subr.mxu0 %v1776_v54  ;;  %v1807_v3 = vld [vmem:[%s5228_s3 + $0x1e0] sm:$0xff]  ;;  %v1758_v15 = vld [vmem:[%s5228_s3 + $0x58] sm:$0xff]  ;;  %v1773_v11 = vld [vmem:[%s5228_s3 + $0xd0] sm:$0xff] }
 0x1d4   : > { %2671 = vmatpush3.msra.mxu1 %v1793_v63  ;;  %2638 = vmatpush3.msra.mxu0 %v1760_v44  ;;  %v1791_v59 = vld [vmem:[%s5228_s3 + $0x160] sm:$0xff]  ;;  %v1806_v35 = vld [vmem:[%s5228_s3 + $0x1d8] sm:$0xff]  ;;  %v1757_v23 = vld [vmem:[%s5228_s3 + $0x50] sm:$0xff] }
 0x1d5   : > { %2672 = vmatprep.subr.mxu1 %v1808_v40  ;;  %2639 = vmatprep.subr.mxu0 %v1775_v2  ;;  %v1790_v12 = vld [vmem:[%s5228_s3 + $0x158] sm:$0xff]  ;;  %v1805_v56 = vld [vmem:[%s5228_s3 + $0x1d0] sm:$0xff]  ;;  %v1772_v16 = vld [vmem:[%s5228_s3 + $0xc8] sm:$0xff] }
 0x1d6   : > { %2673 = vmatpush3.msra.mxu1 %v1792_v19  ;;  %2640 = vmatpush3.msra.mxu0 %v1759_v9  ;;  %v1789_v43 = vld [vmem:[%s5228_s3 + $0x150] sm:$0xff]  ;;  %v1756_v62 = vld [vmem:[%s5228_s3 + $0x48] sm:$0xff]  ;;  %v1771_v48 = vld [vmem:[%s5228_s3 + $0xc0] sm:$0xff] }
 0x1d7   : > { %2674 = vmatprep.subr.mxu1 %v1807_v3  ;;  %2641 = vmatprep.subr.mxu0 %v1774_v29  ;;  %v1804_v39 = vld [vmem:[%s5228_s3 + $0x1c8] sm:$0xff]  ;;  %v1755_v25 = vld [vmem:[%s5228_s3 + $0x40] sm:$0xff]  ;;  %v1770_v30 = vld [vmem:[%s5228_s3 + $0xb8] sm:$0xff] }
 0x1d8   : > { %2675 = vmatpush3.msra.mxu1 %v1791_v59  ;;  %2642 = vmatpush3.msra.mxu0 %v1758_v15  ;;  %v1788_v47 = vld [vmem:[%s5228_s3 + $0x148] sm:$0xff]  ;;  %v1803_v34 = vld [vmem:[%s5228_s3 + $0x1c0] sm:$0xff]  ;;  %v1754_v53 = vld [vmem:[%s5228_s3 + $0x38] sm:$0xff] }
 0x1d9   : > { %2676 = vmatprep.subr.mxu1 %v1806_v35  ;;  %2643 = vmatprep.subr.mxu0 %v1773_v11  ;;  %v1787_v5 = vld [vmem:[%s5228_s3 + $0x140] sm:$0xff]  ;;  %v1802_v33 = vld [vmem:[%s5228_s3 + $0x1b8] sm:$0xff]  ;;  %v1769_v7 = vld [vmem:[%s5228_s3 + $0xb0] sm:$0xff] }
 0x1da   : > { %2677 = vmatpush3.msra.mxu1 %v1790_v12  ;;  %2644 = vmatpush3.msra.mxu0 %v1757_v23  ;;  %v1786_v8 = vld [vmem:[%s5228_s3 + $0x138] sm:$0xff]  ;;  %v1753_v42 = vld [vmem:[%s5228_s3 + $0x30] sm:$0xff]  ;;  %v1768_v22 = vld [vmem:[%s5228_s3 + $0xa8] sm:$0xff] }
 0x1db   : > { %2678 = vmatprep.subr.mxu1 %v1805_v56  ;;  %2645 = vmatprep.subr.mxu0 %v1772_v16  ;;  %v1801_v36 = vld [vmem:[%s5228_s3 + $0x1b0] sm:$0xff]  ;;  %v1752_v13 = vld [vmem:[%s5228_s3 + $0x28] sm:$0xff]  ;;  %v1767_v17 = vld [vmem:[%s5228_s3 + $0xa0] sm:$0xff] }
 0x1dc   : > { %2679 = vmatpush3.msra.mxu1 %v1789_v43  ;;  %2646 = vmatpush3.msra.mxu0 %v1756_v62  ;;  %v1785_v14 = vld [vmem:[%s5228_s3 + $0x130] sm:$0xff]  ;;  %v1800_v4 = vld [vmem:[%s5228_s3 + $0x1a8] sm:$0xff]  ;;  %v1743_v6 = vld [vmem:[#allocation2] sm:$0xff] }
 0x1dd   : > { %2680 = vmatprep.subr.mxu1 %v1804_v39  ;;  %2647 = vmatprep.subr.mxu0 %v1771_v48  ;;  %v1784_v1 = vld [vmem:[%s5228_s3 + $0x128] sm:$0xff]  ;;  %v1751_v55 = vld [vmem:[%s5228_s3 + $0x20] sm:$0xff]  ;;  %v1766_v51 = vld [vmem:[%s5228_s3 + $0x98] sm:$0xff]  ;;  %v4756_v20 = vmul.f32 0.00390625, %v1743_v6 }
 0x1de   : > { %2681 = vmatpush3.msra.mxu1 %v1788_v47  ;;  %2648 = vmatpush3.msra.mxu0 %v1755_v25  ;;  %v1799_v32 = vld [vmem:[%s5228_s3 + $0x1a0] sm:$0xff]  ;;  %v1750_v38 = vld [vmem:[%s5228_s3 + $0x18] sm:$0xff]  ;;  %v1765_v58 = vld [vmem:[%s5228_s3 + $0x90] sm:$0xff] }
 0x1df   : > { %2682 = vmatprep.subr.mxu1 %v1803_v34  ;;  %2649 = vmatprep.subr.mxu0 %v1770_v30  ;;  %v1783_v60 = vld [vmem:[%s5228_s3 + $0x120] sm:$0xff]  ;;  %v1798_v21 = vld [vmem:[%s5228_s3 + $0x198] sm:$0xff]  ;;  %v1749_v28 = vld [vmem:[%s5228_s3 + $0x10] sm:$0xff] }
 0x1e0   : > { %2683 = vmatpush3.msra.mxu1 %v1787_v5  ;;  %2650 = vmatpush3.msra.mxu0 %v1754_v53  ;;  %v1782_v24 = vld [vmem:[%s5228_s3 + $0x118] sm:$0xff]  ;;  %v1797_v46 = vld [vmem:[%s5228_s3 + $0x190] sm:$0xff]  ;;  %v1764_v52 = vld [vmem:[%s5228_s3 + $0x88] sm:$0xff] }
 0x1e1   : > { %2684 = vmatprep.subr.mxu1 %v1802_v33  ;;  %2651 = vmatprep.subr.mxu0 %v1769_v7  ;;  %v1781_v45 = vld [vmem:[%s5228_s3 + $0x110] sm:$0xff]  ;;  %v1748_v27 = vld [vmem:[%s5228_s3 + $0x8] sm:$0xff]  ;;  %v5440_v49 = vld [vmem:[#allocation8_spill] sm:$0xff] }
 0x1e2   : > { %2685 = vmatpush3.msra.mxu1 %v1786_v8  ;;  %2652 = vmatpush3.msra.mxu0 %v1753_v42  ;;  %v1796_v37 = vld [vmem:[%s5228_s3 + $0x188] sm:$0xff]  ;;  %v1933_v26 = vrot.slane %v4756_v20, %v5440_v49  ;;  %v1763_v57 = vld [vmem:[%s5228_s3 + $0x80] sm:$0xff]  ;;  %v5441_v10 = vld [vmem:[#allocation7_spill] sm:$0xff] }
 0x1e3   : > { %2686 = vmatprep.subr.mxu1 %v1801_v36  ;;  %2653 = vmatprep.subr.mxu0 %v1768_v22  ;;  %v1747_v61 = vld [vmem:[%s5228_s3] sm:$0xff]  ;;  %v1780_v0 = vld [vmem:[%s5228_s3 + $0x108] sm:$0xff]  ;;  %v1929_v50 = vrot.slane %v4756_v20, %v5441_v10  ;;  %v1842_v18 = vld [vmem:[%s5228_s3 + $0x2f8] sm:$0xff] }
 0x1e4   : > { %2687 = vmatpush3.msra.mxu1 %v1785_v14  ;;  %2654 = vmatpush3.msra.mxu0 %v1752_v13  ;;  %v1795_v41 = vld [vmem:[%s5228_s3 + $0x180] sm:$0xff]  ;;  %v5442_v31 = vld [vmem:[#allocation6_spill] sm:$0xff]  ;;  %v1826_v40 = vld [vmem:[%s5228_s3 + $0x278] sm:$0xff] }
 0x1e5   : > { %2688 = vmatprep.subr.mxu1 %v1800_v4  ;;  %2655 = vmatprep.subr.mxu0 %v1767_v17  ;;  %v1779_v54 = vld [vmem:[%s5228_s3 + $0x100] sm:$0xff]  ;;  %v5443_v44 = vsub.s32 3, %v5442_v31  ;;  %v1841_v9 = vld [vmem:[%s5228_s3 + $0x2f0] sm:$0xff]  ;;  %v1874_v3 = vld [vmem:[%s5228_s3 + $0x3f8] sm:$0xff] }
 0x1e6   : > { %2689 = vmatpush3.msra.mxu1 %v1784_v1  ;;  %2656 = vmatpush3.msra.mxu0 %v1751_v55  ;;  %v5444_v2 = vld [vmem:[#allocation9_spill] sm:$0xff]  ;;  %v1825_v29 = vld [vmem:[%s5228_s3 + $0x270] sm:$0xff]  ;;  %v1858_v59 = vld [vmem:[%s5228_s3 + $0x378] sm:$0xff] }
 0x1e7   : > { %2690 = vmatprep.subr.mxu1 %v1799_v32  ;;  %2657 = vmatprep.subr.mxu0 %v1766_v51  ;;  %v1941_v63 = vrot.slane %v4756_v20, %v5443_v44  ;;  %v1937_v19 = vrot.slane %v4756_v20, %v5444_v2  ;;  %v1840_v15 = vld [vmem:[%s5228_s3 + $0x2e8] sm:$0xff]  ;;  %v1873_v35 = vld [vmem:[%s5228_s3 + $0x3f0] sm:$0xff]  ;;  %v1839_v23 = vld [vmem:[%s5228_s3 + $0x2e0] sm:$0xff] }
 0x1e8   : > { %2691 = vmatpush3.msra.mxu1 %v1783_v60  ;;  %2658 = vmatpush3.msra.mxu0 %v1750_v38  ;;  %v1824_v11 = vld [vmem:[%s5228_s3 + $0x268] sm:$0xff]  ;;  %v1857_v12 = vld [vmem:[%s5228_s3 + $0x370] sm:$0xff]  ;;  %v1823_v16 = vld [vmem:[%s5228_s3 + $0x260] sm:$0xff] }
 0x1e9   : > { %2692 = vmatprep.subr.mxu1 %v1798_v21  ;;  %2659 = vmatprep.subr.mxu0 %v1765_v58  ;;  %v1872_v56 = vld [vmem:[%s5228_s3 + $0x3e8] sm:$0xff]  ;;  %v1838_v62 = vld [vmem:[%s5228_s3 + $0x2d8] sm:$0xff]  ;;  %v1871_v39 = vld [vmem:[%s5228_s3 + $0x3e0] sm:$0xff] }
 0x1ea   : > { %2693 = vmatpush3.msra.mxu1 %v1782_v24  ;;  %2660 = vmatpush3.msra.mxu0 %v1749_v28  ;;  %v1856_v43 = vld [vmem:[%s5228_s3 + $0x368] sm:$0xff]  ;;  %v1822_v48 = vld [vmem:[%s5228_s3 + $0x258] sm:$0xff]  ;;  %v1855_v47 = vld [vmem:[%s5228_s3 + $0x360] sm:$0xff] }
 0x1eb   : > { %2694 = vmatprep.subr.mxu1 %v1797_v46  ;;  %2661 = vmatprep.subr.mxu0 %v1764_v52  ;;  %v1837_v25 = vld [vmem:[%s5228_s3 + $0x2d0] sm:$0xff]  ;;  %v1870_v34 = vld [vmem:[%s5228_s3 + $0x3d8] sm:$0xff]  ;;  %v1836_v53 = vld [vmem:[%s5228_s3 + $0x2c8] sm:$0xff] }
 0x1ec   : > { %2695 = vmatpush3.msra.mxu1 %v1781_v45  ;;  %2662 = vmatpush3.msra.mxu0 %v1748_v27  ;;  %v1821_v30 = vld [vmem:[%s5228_s3 + $0x250] sm:$0xff]  ;;  %v1854_v5 = vld [vmem:[%s5228_s3 + $0x358] sm:$0xff]  ;;  %v1820_v7 = vld [vmem:[%s5228_s3 + $0x248] sm:$0xff] }
 0x1ed   : > { %2696 = vmatprep.subr.mxu1 %v1796_v37  ;;  %2663 = vmatprep.subr.mxu0 %v1763_v57  ;;  %v1869_v33 = vld [vmem:[%s5228_s3 + $0x3d0] sm:$0xff]  ;;  %v1835_v42 = vld [vmem:[%s5228_s3 + $0x2c0] sm:$0xff]  ;;  %v1868_v36 = vld [vmem:[%s5228_s3 + $0x3c8] sm:$0xff] }
 0x1ee   : > { %2045 = vmatprep.mubr.f32.mxu0 %v1933_v26  ;;  %2664 = vmatpush3.msra.mxu0 %v1747_v61  ;;  %v1853_v8 = vld [vmem:[%s5228_s3 + $0x350] sm:$0xff]  ;;  %v1819_v22 = vld [vmem:[%s5228_s3 + $0x240] sm:$0xff]  ;;  %v1852_v14 = vld [vmem:[%s5228_s3 + $0x348] sm:$0xff] }
 0x1ef   : > { %2697 = vmatpush3.msra.mxu1 %v1780_v0  ;;  %2046 = vmatmul.mubr.f32.vlgmr.msra.gmra.mxu0 %v1929_v50  ;;  %v1834_v13 = vld [vmem:[%s5228_s3 + $0x2b8] sm:$0xff]  ;;  %v1867_v4 = vld [vmem:[%s5228_s3 + $0x3c0] sm:$0xff]  ;;  %v1833_v6 = vld [vmem:[%s5228_s3 + $0x2b0] sm:$0xff] }
 0x1f0   : > { %2698 = vmatprep.subr.mxu1 %v1795_v41  ;;  %2703 = vmatprep.subr.mxu0 %v1842_v18  ;;  %v1818_v17 = vld [vmem:[%s5228_s3 + $0x238] sm:$0xff]  ;;  %v1851_v1 = vld [vmem:[%s5228_s3 + $0x340] sm:$0xff]  ;;  %v1817_v32 = vld [vmem:[%s5228_s3 + $0x230] sm:$0xff] }
 0x1f1   : > { %2699 = vmatpush3.msra.mxu1 %v1779_v54  ;;  %2115 = vmatprep.mubr.f32.mxu1 %v1941_v63  ;;  %v1866_v55 = vld [vmem:[%s5228_s3 + $0x3b8] sm:$0xff]  ;;  %v1832_v60 = vld [vmem:[%s5228_s3 + $0x2a8] sm:$0xff]  ;;  %v1865_v38 = vld [vmem:[%s5228_s3 + $0x3b0] sm:$0xff] }
 0x1f2   : > { %2704 = vmatpush3.msra.mxu0 %v1826_v40  ;;  %2116 = vmatmul.mubr.f32.vlgmr.msra.gmra.mxu1 %v1937_v19  ;;  %v1850_v51 = vld [vmem:[%s5228_s3 + $0x338] sm:$0xff]  ;;  %v1816_v21 = vld [vmem:[%s5228_s3 + $0x228] sm:$0xff]  ;;  %v1849_v58 = vld [vmem:[%s5228_s3 + $0x330] sm:$0xff] }
 0x1f3   : > { %2705 = vmatprep.subr.mxu0 %v1841_v9  ;;  %2738 = vmatprep.subr.mxu1 %v1874_v3  ;;  %v1831_v24 = vld [vmem:[%s5228_s3 + $0x2a0] sm:$0xff]  ;;  %v1864_v28 = vld [vmem:[%s5228_s3 + $0x3a8] sm:$0xff]  ;;  %v1830_v45 = vld [vmem:[%s5228_s3 + $0x298] sm:$0xff]  ;;  %v5445_v9 = vsub.s32 5, %v5442_v31 }
 0x1f4   : > { %2706 = vmatpush3.msra.mxu0 %v1825_v29  ;;  %2739 = vmatpush3.msra.mxu1 %v1858_v59  ;;  %v1815_v46 = vld [vmem:[%s5228_s3 + $0x220] sm:$0xff]  ;;  %v1848_v52 = vld [vmem:[%s5228_s3 + $0x328] sm:$0xff]  ;;  %v1814_v37 = vld [vmem:[%s5228_s3 + $0x218] sm:$0xff]  ;;  %v5446_v59 = vsub.s32 4, %v5442_v31 }
 0x1f5   : > { %2707 = vmatprep.subr.mxu0 %v1840_v15  ;;  %2740 = vmatprep.subr.mxu1 %v1873_v35  ;;  %v1863_v27 = vld [vmem:[%s5228_s3 + $0x3a0] sm:$0xff]  ;;  %v1829_v57 = vld [vmem:[%s5228_s3 + $0x290] sm:$0xff]  ;;  %v1862_v61 = vld [vmem:[%s5228_s3 + $0x398] sm:$0xff]  ;;  %v1949_v3 = vrot.slane %v4756_v20, %v5445_v9 }
 0x1f6   : > { %2708 = vmatpush3.msra.mxu0 %v1824_v11  ;;  %2741 = vmatpush3.msra.mxu1 %v1857_v12  ;;  %v1847_v26 = vld [vmem:[%s5228_s3 + $0x320] sm:$0xff]  ;;  %v1813_v0 = vld [vmem:[%s5228_s3 + $0x210] sm:$0xff]  ;;  %v1846_v50 = vld [vmem:[%s5228_s3 + $0x318] sm:$0xff]  ;;  %v1945_v15 = vrot.slane %v4756_v20, %v5446_v59 }
 0x1f7   : > { %2709 = vmatprep.subr.mxu0 %v1839_v23  ;;  %2742 = vmatprep.subr.mxu1 %v1872_v56  ;;  %v1828_v41 = vld [vmem:[%s5228_s3 + $0x288] sm:$0xff]  ;;  %v1861_v18 = vld [vmem:[%s5228_s3 + $0x390] sm:$0xff]  ;;  %v1827_v63 = vld [vmem:[%s5228_s3 + $0x280] sm:$0xff]  ;;  %v5447_v23 = vsub.s32 7, %v5442_v31 }
 0x1f8   : > { %2710 = vmatpush3.msra.mxu0 %v1823_v16  ;;  %2743 = vmatpush3.msra.mxu1 %v1856_v43  ;;  %v1812_v54 = vld [vmem:[%s5228_s3 + $0x208] sm:$0xff]  ;;  %v1845_v44 = vld [vmem:[%s5228_s3 + $0x310] sm:$0xff]  ;;  %v1811_v19 = vld [vmem:[%s5228_s3 + $0x200] sm:$0xff]  ;;  %v5448_v43 = vsub.s32 6, %v5442_v31 }
 0x1f9   : > { %2711 = vmatprep.subr.mxu0 %v1838_v62  ;;  %2744 = vmatprep.subr.mxu1 %v1871_v39  ;;  %v1860_v40 = vld [vmem:[%s5228_s3 + $0x388] sm:$0xff]  ;;  %v1859_v35 = vld [vmem:[%s5228_s3 + $0x380] sm:$0xff]  ;;  %v1906_v11 = vld [vmem:[%s5228_s3 + $0x4f8] sm:$0xff]  ;;  %v1957_v56 = vrot.slane %v4756_v20, %v5447_v23 }
 0x1fa   : > { %2712 = vmatpush3.msra.mxu0 %v1822_v48  ;;  %2745 = vmatpush3.msra.mxu1 %v1855_v47  ;;  %v1844_v29 = vld [vmem:[%s5228_s3 + $0x308] sm:$0xff]  ;;  %v1843_v12 = vld [vmem:[%s5228_s3 + $0x300] sm:$0xff]  ;;  %v1890_v16 = vld [vmem:[%s5228_s3 + $0x478] sm:$0xff]  ;;  %v1953_v62 = vrot.slane %v4756_v20, %v5448_v43 }
 0x1fb   : > { %2713 = vmatprep.subr.mxu0 %v1837_v25  ;;  %2746 = vmatprep.subr.mxu1 %v1870_v34  ;;  %v1905_v39 = vld [vmem:[%s5228_s3 + $0x4f0] sm:$0xff]  ;;  %v1904_v31 = vld [vmem:[%s5228_s3 + $0x4e8] sm:$0xff]  ;;  %v1922_v20 = vld [vmem:[%s5228_s3 + $0x578] sm:$0xff]  ;;  %v3419_v25 = vmov 0.0  }
 0x1fc   : > { %2714 = vmatpush3.msra.mxu0 %v1821_v30  ;;  %2747 = vmatpush3.msra.mxu1 %v1854_v5  ;;  %v1889_v48 = vld [vmem:[%s5228_s3 + $0x470] sm:$0xff]  ;;  %v1888_v47 = vld [vmem:[%s5228_s3 + $0x468] sm:$0xff]  ;;  %v1903_v34 = vld [vmem:[%s5228_s3 + $0x4e0] sm:$0xff] }
 0x1fd   : > { %2715 = vmatprep.subr.mxu0 %v1836_v53  ;;  %2748 = vmatprep.subr.mxu1 %v1869_v33  ;;  %v1921_v30 = vld [vmem:[%s5228_s3 + $0x570] sm:$0xff]  ;;  %v1887_v5 = vld [vmem:[%s5228_s3 + $0x460] sm:$0xff]  ;;  %v1902_v53 = vld [vmem:[%s5228_s3 + $0x4d8] sm:$0xff] }
 0x1fe   : > { %2716 = vmatpush3.msra.mxu0 %v1820_v7  ;;  %2749 = vmatpush3.msra.mxu1 %v1853_v8  ;;  %v1920_v33 = vld [vmem:[%s5228_s3 + $0x568] sm:$0xff]  ;;  %v1886_v7 = vld [vmem:[%s5228_s3 + $0x458] sm:$0xff]  ;;  %v1901_v8 = vld [vmem:[%s5228_s3 + $0x4d0] sm:$0xff] }
 0x1ff   : > { %2717 = vmatprep.subr.mxu0 %v1835_v42  ;;  %2750 = vmatprep.subr.mxu1 %v1868_v36  ;;  %v1919_v42 = vld [vmem:[%s5228_s3 + $0x560] sm:$0xff]  ;;  %v1885_v36 = vld [vmem:[%s5228_s3 + $0x450] sm:$0xff] }
 0x200   : > { %2718 = vmatpush3.msra.mxu0 %v1819_v22  ;;  %2751 = vmatpush3.msra.mxu1 %v1852_v14  ;;  %v1900_v22 = vld [vmem:[%s5228_s3 + $0x4c8] sm:$0xff]  ;;  %v1918_v14 = vld [vmem:[%s5228_s3 + $0x558] sm:$0xff] }
 0x201   : > { %2719 = vmatprep.subr.mxu0 %v1834_v13  ;;  %2752 = vmatprep.subr.mxu1 %v1867_v4  ;;  %v1884_v13 = vld [vmem:[%s5228_s3 + $0x448] sm:$0xff]  ;;  %v1899_v4 = vld [vmem:[%s5228_s3 + $0x4c0] sm:$0xff] }
 0x202   : > { %2720 = vmatpush3.msra.mxu0 %v1818_v17  ;;  %2753 = vmatpush3.msra.mxu1 %v1851_v1  ;;  %v1917_v17 = vld [vmem:[%s5228_s3 + $0x550] sm:$0xff]  ;;  %v1883_v1 = vld [vmem:[%s5228_s3 + $0x440] sm:$0xff] }
 0x203   : > { %2721 = vmatprep.subr.mxu0 %v1833_v6  ;;  %2754 = vmatprep.subr.mxu1 %v1866_v55  ;;  %v1898_v6 = vld [vmem:[%s5228_s3 + $0x4b8] sm:$0xff]  ;;  %v1916_v55 = vld [vmem:[%s5228_s3 + $0x548] sm:$0xff] }
 0x204   : > { %2722 = vmatpush3.msra.mxu0 %v1817_v32  ;;  %2755 = vmatpush3.msra.mxu1 %v1850_v51  ;;  %v1882_v32 = vld [vmem:[%s5228_s3 + $0x438] sm:$0xff]  ;;  %v1897_v51 = vld [vmem:[%s5228_s3 + $0x4b0] sm:$0xff] }
 0x205   : > { %2723 = vmatprep.subr.mxu0 %v1832_v60  ;;  %2756 = vmatprep.subr.mxu1 %v1865_v38  ;;  %v1915_v60 = vld [vmem:[%s5228_s3 + $0x540] sm:$0xff]  ;;  %v1881_v38 = vld [vmem:[%s5228_s3 + $0x430] sm:$0xff] }
 0x206   : > { %2724 = vmatpush3.msra.mxu0 %v1816_v21  ;;  %2757 = vmatpush3.msra.mxu1 %v1849_v58  ;;  %v1896_v21 = vld [vmem:[%s5228_s3 + $0x4a8] sm:$0xff]  ;;  %v1914_v58 = vld [vmem:[%s5228_s3 + $0x538] sm:$0xff] }
 0x207   : > { %2725 = vmatprep.subr.mxu0 %v1831_v24  ;;  %2758 = vmatprep.subr.mxu1 %v1864_v28  ;;  %v1880_v24 = vld [vmem:[%s5228_s3 + $0x428] sm:$0xff]  ;;  %v1895_v28 = vld [vmem:[%s5228_s3 + $0x4a0] sm:$0xff] }
 0x208   : > { %2726 = vmatpush3.msra.mxu0 %v1815_v46  ;;  %2759 = vmatpush3.msra.mxu1 %v1848_v52  ;;  %v1913_v46 = vld [vmem:[%s5228_s3 + $0x530] sm:$0xff]  ;;  %v1744_v52 = vld [vmem:[#allocation2 + $0x8] sm:$0x7] }
 0x209   : > { %2727 = vmatprep.subr.mxu0 %v1830_v45  ;;  %2760 = vmatprep.subr.mxu1 %v1863_v27  ;;  %v1879_v45 = vld [vmem:[%s5228_s3 + $0x420] sm:$0xff]  ;;  %v1894_v27 = vld [vmem:[%s5228_s3 + $0x498] sm:$0xff] }
 0x20a   : > { %2728 = vmatpush3.msra.mxu0 %v1814_v37  ;;  %2761 = vmatpush3.msra.mxu1 %v1847_v26  ;;  %v1912_v37 = vld [vmem:[%s5228_s3 + $0x528] sm:$0xff]  ;;  %v1878_v26 = vld [vmem:[%s5228_s3 + $0x418] sm:$0xff] }
 0x20b   : > { %2729 = vmatprep.subr.mxu0 %v1829_v57  ;;  %2762 = vmatprep.subr.mxu1 %v1862_v61  ;;  %v1746_v57 = vmul.f32 0.00390625, %v1744_v52  ;;  %v1893_v61 = vld [vmem:[%s5228_s3 + $0x490] sm:$0xff] }
 0x20c   : > { %2730 = vmatpush3.msra.mxu0 %v1813_v0  ;;  %2763 = vmatpush3.msra.mxu1 %v1846_v50  ;;  %v1911_v0 = vld [vmem:[%s5228_s3 + $0x520] sm:$0xff]  ;;  %v1877_v50 = vld [vmem:[%s5228_s3 + $0x410] sm:$0xff] }
 0x20d   : > { %2731 = vmatprep.subr.mxu0 %v1828_v41  ;;  %2764 = vmatprep.subr.mxu1 %v1861_v18  ;;  %v1892_v41 = vld [vmem:[%s5228_s3 + $0x488] sm:$0xff]  ;;  %v1910_v18 = vld [vmem:[%s5228_s3 + $0x518] sm:$0xff]  ;;  %v1961_v9 = vrot.slane %v1746_v57, %v5441_v10  ;;  %v1969_v10 = vrot.slane %v1746_v57, %v5444_v2 }
 0x20e   : > { %2732 = vmatpush3.msra.mxu0 %v1812_v54  ;;  %2765 = vmatpush3.msra.mxu1 %v1845_v44  ;;  %v1876_v54 = vld [vmem:[%s5228_s3 + $0x408] sm:$0xff]  ;;  %v1965_v44 = vrot.slane %v1746_v57, %v5440_v49 }
 0x20f   : > { %2733 = vmatprep.subr.mxu0 %v1827_v63  ;;  %2766 = vmatprep.subr.mxu1 %v1860_v40  ;;  %v1891_v63 = vld [vmem:[%s5228_s3 + $0x480] sm:$0xff]  ;;  %v1908_v49 = vld [vmem:[%s5228_s3 + $0x508] sm:$0xff] }
 0x210   : > { %2734 = vmatpush3.msra.mxu0 %v1811_v19  ;;  %2185 = vmatprep.mubr.f32.mxu0 %v1949_v3  ;;  %v1875_v40 = vld [vmem:[%s5228_s3 + $0x400] sm:$0xff]  ;;  %v1909_v19 = vld [vmem:[%s5228_s3 + $0x510] sm:$0xff] }
 0x211   : > { %2767 = vmatpush3.msra.mxu1 %v1844_v29  ;;  %2186 = vmatmul.mubr.f32.vlgmr.msra.gmra.mxu0 %v1945_v15  ;;  %v1907_v3 = vld [vmem:[%s5228_s3 + $0x500] sm:$0xff] }
 0x212   : > { %2768 = vmatprep.subr.mxu1 %v1859_v35  ;;  %2773 = vmatprep.subr.mxu0 %v1906_v11 }
 0x213   : > { %2769 = vmatpush3.msra.mxu1 %v1843_v12  ;;  %2255 = vmatprep.mubr.f32.mxu1 %v1957_v56  ;;  %v1923_v12 = vld [vmem:[%s5229_s4] sm:$0x1] }
 0x214   : > { %2774 = vmatpush3.msra.mxu0 %v1890_v16  ;;  %2256 = vmatmul.mubr.f32.vlgmr.msra.gmra.mxu1 %v1953_v62 }
 0x215   : > { %2775 = vmatprep.subr.mxu0 %v1905_v39  ;;  %2835 = vmatprep.subr.mxu1 %v3419_v25 }
 0x216   : > { %2776 = vmatpush3.msra.mxu0 %v1889_v48  ;;  %2836 = vmatpush3.msra.mxu1 %v1922_v20 }
 0x217   : > { %2777 = vmatprep.subr.mxu0 %v1904_v31  ;;  %2837 = vmatprep.subr.mxu1 %v3419_v25 }
 0x218   : > { %2778 = vmatpush3.msra.mxu0 %v1888_v47  ;;  %2838 = vmatpush3.msra.mxu1 %v1921_v30 }
 0x219   : > { %2779 = vmatprep.subr.mxu0 %v1903_v34  ;;  %2839 = vmatprep.subr.mxu1 %v3419_v25 }
 0x21a   : > { %2780 = vmatpush3.msra.mxu0 %v1887_v5  ;;  %2840 = vmatpush3.msra.mxu1 %v1920_v33 }
 0x21b   : > { %2781 = vmatprep.subr.mxu0 %v1902_v53  ;;  %2841 = vmatprep.subr.mxu1 %v3419_v25 }
 0x21c   : > { %2782 = vmatpush3.msra.mxu0 %v1886_v7  ;;  %2842 = vmatpush3.msra.mxu1 %v1919_v42 }
 0x21d   : > { %2783 = vmatprep.subr.mxu0 %v1901_v8  ;;  %2843 = vmatprep.subr.mxu1 %v3419_v25 }
 0x21e   : > { %2784 = vmatpush3.msra.mxu0 %v1885_v36  ;;  %2844 = vmatpush3.msra.mxu1 %v1918_v14 }
 0x21f   : > { %2785 = vmatprep.subr.mxu0 %v1900_v22  ;;  %2845 = vmatprep.subr.mxu1 %v3419_v25 }
 0x220   : > { %2786 = vmatpush3.msra.mxu0 %v1884_v13  ;;  %2846 = vmatpush3.msra.mxu1 %v1917_v17 }
 0x221   : > { %2787 = vmatprep.subr.mxu0 %v1899_v4  ;;  %2847 = vmatprep.subr.mxu1 %v3419_v25 }
 0x222   : > { %2788 = vmatpush3.msra.mxu0 %v1883_v1  ;;  %2848 = vmatpush3.msra.mxu1 %v1916_v55 }
 0x223   : > { %2789 = vmatprep.subr.mxu0 %v1898_v6  ;;  %2849 = vmatprep.subr.mxu1 %v3419_v25 }
 0x224   : > { %2790 = vmatpush3.msra.mxu0 %v1882_v32  ;;  %2850 = vmatpush3.msra.mxu1 %v1915_v60 }
 0x225   : > { %2791 = vmatprep.subr.mxu0 %v1897_v51  ;;  %2851 = vmatprep.subr.mxu1 %v3419_v25 }
 0x226   : > { %2792 = vmatpush3.msra.mxu0 %v1881_v38  ;;  %2852 = vmatpush3.msra.mxu1 %v1914_v58 }
 0x227   : > { %2793 = vmatprep.subr.mxu0 %v1896_v21  ;;  %2853 = vmatprep.subr.mxu1 %v3419_v25 }
 0x228   : > { %2794 = vmatpush3.msra.mxu0 %v1880_v24  ;;  %2854 = vmatpush3.msra.mxu1 %v1913_v46 }
 0x229   : > { %2795 = vmatprep.subr.mxu0 %v1895_v28  ;;  %2855 = vmatprep.subr.mxu1 %v3419_v25 }
 0x22a   : > { %2796 = vmatpush3.msra.mxu0 %v1879_v45  ;;  %2856 = vmatpush3.msra.mxu1 %v1912_v37 }
 0x22b   : > { %2797 = vmatprep.subr.mxu0 %v1894_v27  ;;  %2857 = vmatprep.subr.mxu1 %v3419_v25 }
 0x22c   : > { %2798 = vmatpush3.msra.mxu0 %v1878_v26  ;;  %2858 = vmatpush3.msra.mxu1 %v1911_v0 }
 0x22d   : > { %2799 = vmatprep.subr.mxu0 %v1893_v61  ;;  %2859 = vmatprep.subr.mxu1 %v3419_v25 }
 0x22e   : > { %2800 = vmatpush3.msra.mxu0 %v1877_v50  ;;  %2860 = vmatpush3.msra.mxu1 %v1910_v18 }
 0x22f   : > { %2801 = vmatprep.subr.mxu0 %v1892_v41  ;;  %2861 = vmatprep.subr.mxu1 %v3419_v25 }
 0x230   : > { %2802 = vmatpush3.msra.mxu0 %v1876_v54  ;;  %2325 = vmatprep.mubr.f32.mxu0 %v1965_v44 }
 0x231   : > { %2803 = vmatprep.subr.mxu0 %v1891_v63  ;;  %2862 = vmatpush3.msra.mxu1 %v1909_v19 }
 0x232   : > { %2804 = vmatpush3.msra.mxu0 %v1875_v40  ;;  %2863 = vmatprep.subr.mxu1 %v3419_v25 }
 0x233   : > { %2326 = vmatmul.mubr.f32.vlgmr.msra.gmra.mxu0 %v1961_v9  ;;  %2864 = vmatpush3.msra.mxu1 %v1908_v49 }
 0x234   : > { %2867 = vmatprep.mubr.msk.f32.mxu1 %vm3420_vm5, %v3419_v25  ;;  %2865 = vmatprep.subr.mxu1 %v3419_v25 }
 0x235   : > { %2866 = vmatpush3.msra.mxu1 %v1907_v3 }
 0x236   : > { %2868 = vmatmul.mubr.f32.vlgmr.msra.gmra.mxu1 %v1969_v10 }
 0x2af   : > { %v2665_v29 = vpop.f32.mrf.mxu0 }
 0x2b1   : > { %v2666_v59 = vpop.f32.mrf.mxu0 }
 0x2b2   : > { %v2700_v15 = vpop.f32.mrf.mxu1  ;;  %v2667_v11 = vadd.f32 %v2666_v59, %v2665_v29 }
 0x2b4   : > { %v2701_v23 = vpop.f32.mrf.mxu1  ;;  %v2048_v16 = vadd.f32 %v2667_v11, %v1923_v12 }
 0x2b5   : > { %v2702_v43 = vadd.f32 %v2701_v23, %v2700_v15 }
 0x2b7   : > { %v2118_v48 = vadd.f32 %v2702_v43, %v2048_v16 }
 0x2d1   : > { %v2735_v35 = vpop.f32.mrf.mxu0 }
 0x2d3   : > { %v2736_v56 = vpop.f32.mrf.mxu0 }
 0x2d4   : > { %v2770_v2 = vpop.f32.mrf.mxu1  ;;  %v2737_v62 = vadd.f32 %v2736_v56, %v2735_v35 }
 0x2d6   : > { %v2771_v39 = vpop.f32.mrf.mxu1  ;;  %v2188_v31 = vadd.f32 %v2737_v62, %v2118_v48 }
 0x2d7   : > { %v2772_v20 = vadd.f32 %v2771_v39, %v2770_v2 }
 0x2d9   : > { %v2258_v34 = vadd.f32 %v2772_v20, %v2188_v31 }
 0x2f3   : > { %v2805_v47 = vpop.f32.mrf.mxu0 }
 0x2f5   : > { %v2806_v25 = vpop.f32.mrf.mxu0 }
 0x2f6   : > { %v2807_v30 = vadd.f32 %v2806_v25, %v2805_v47  ;;  %v2397_v5 = vpop.f32.mrf.mxu1 }
 0x2f8   : > { %v2328_v53 = vadd.f32 %v2807_v30, %v2258_v34  ;;  %v2869_v33 = vpop.f32.mrf.mxu1 }
 0x2fa   : > { %v2398_v7 = vadd.f32 %v2397_v5, %v2328_v53 }
 0x2fc   : > { %2402 = vst.msk [vmem:[%s3532_s27] sm:$0x1] %vm2401_vm6, %v2398_v7 }
 0x2fd PF: > { %s2625_s7 = sshll.u32 %s3401_s22, 4  ;;  %s2416_s26 = sshll.u32 %s3532_s27, 4  ;;  %s2417_s26 = int_to_ptr.vmem [resolvable:$true] %s2416_s26 }
 0x2fe   : > { %s2414_s12 = scalar_lea.hbm %s5230_s5, %s2625_s7  ;;  %s2404_s13 = scalar_lea.sflag [#allocation4], %s238_s10 }
 0x2ff   : > { %s3321_s14 = scalar_lea.vmem %s2417_s26, 16  ;;  %s3421_s21 = smov [#allocation3]  }
 0x300   : > { %p3322_p2 = scmp.ne.s32.totalorder %s2417_s26, %s3321_s14  ;;  %s3325_s15 = sshll.u32 %s3421_s21, 4  ;;  %s3326_s15 = int_to_ptr.vmem [resolvable:$false] %s3325_s15 }
 0x301   : > { %s3327_s16 = scalar_lea.vmem %s3326_s15, 32  ;;  %p3328_p6 = scmp.lt.s32.totalorder %s2417_s26, %s3326_s15 }
 0x302   : > { %p3323_p4 = pnand %p3322_p2, %p3501_p3  ;;  %p3329_p7 = scmp.lt.s32.totalorder %s3327_s16, %s3321_s14 }
 0x304   : > { %p3324_p5 = pneg %p3323_p4  ;;  %p3330_p8 = por %p3329_p7, %p3328_p6 }
 0x306   : > { %p3331_p10 = pnand %p3330_p8, %p3324_p5 }
 0x308   : > { %3334 = shalt.err (!%p3331_p10)
}
 0x309   : > { %s3335_s22 = scalar_lea.hbm %s2414_s12, 16  ;;  %s3339_s17 = scalar_lea.hbm %s5230_s5, 32 }
 0x30a   : > { %p3336_p11 = scmp.ne.s32.totalorder %s2414_s12, %s3335_s22  ;;  %p3340_p0 = scmp.lt.s32.totalorder %s2414_s12, %s5230_s5 }
 0x30b   : > { %p3341_p1 = scmp.lt.s32.totalorder %s3339_s17, %s3335_s22 }
 0x30c   : > { %p3337_p12 = pnand %p3336_p11, %p3501_p3 }
 0x30d   : > { %p3342_p2 = por %p3341_p1, %p3340_p0 }
 0x30e   : > { %p3338_p13 = pneg %p3337_p12 }
 0x310   : > { %p3343_p4 = pnand %p3342_p2, %p3338_p13 }
 0x312   : > { %3346 = shalt.err (!%p3343_p4)
}
 0x313   : > { %2872 = dma.vmem_to_hbm [thread:$0]  (%p3501_p3), %s2417_s26, 16, %s2414_s12, %s2404_s13  }
 0x314 PF: > { %p2878_p5 = scmp.ge.s32.totalorder %s3413_s25, 2  ;;  %s2428_s11 = sand.u32 1, %s3385_s18  }
 0x315   : > { %s2429_s14 = scalar_lea.sflag [#allocation4], %s2428_s11 }
 0x316   : > { %p2875_p6 = pnand %p2878_p5, %p3511_p9 }
 0x318   : > { %p2876_p7 = pneg %p2875_p6 }
 0x31a   : > { %3380 = dma.done.wait (%p2876_p7), %s2429_s14, 16  }
 0x31b   : > { %3382 = vsyncadd (%p2876_p7), %s2429_s14, 4294967280  ;;  %s18_s25 = sadd.s32 1, %s3413_s25   ;;  %s5449_s18 = smov %s3389_s19 }
 0x31c   : > { %p15_p8 = scmp.ge.s32.totalorder %s18_s25, 10   ;;  %s5450_s19 = smov %s3393_s20 }
 0x31d   : > { %s5451_s20 = smov %s3519_s9  ;;  %s5452_s21 = smov %s3405_s23 }
 0x31e   : > { %s5453_s22 = smov %s3409_s24  ;;  %s5454_s23 = smov %s5457_s28 }
 0x31f   : > { %s5455_s24 = smov %s5461_s29  ;;  %17 = sbr.rel (!%p15_p8) target bundleno = 5 (0x5), region = 83 }
 0x324   :  { %2433 = vsyncpa [#allocation4], 1 }
 0x325   :  { %2435 = vsyncpa [#allocation4 + $0x1], 1 }

</bundles_post_ra>
